<compile_context>
chip_gen: v6e
topology: v6e:2x2x1
jax: 0.10.0
libtpu: 0.0.40
codegen_flags: <defaults>
</compile_context>

<pallas_src>
import functools

import jax
import jax.numpy as jnp
from jax.experimental import pallas as pl
from jax.experimental.pallas import tpu as pltpu


def residual_sa_kernel(x_ref, gamma_ref, beta_ref, wqkv_ref, bqkv_ref,
                       wo_ref, bout_ref, o_ref, y_scr, *, n_head, eps):
    x_cs = x_ref[0]                                # (C, S) f32, one batch element
    C, S = x_cs.shape
    hd = C // n_head

    # --- GroupNorm(1, C, affine=True): stats over the whole sample (f32) ----
    inv_n = 1.0 / (S * C)
    mean = jnp.sum(x_cs) * inv_n
    # Single in-kernel transpose (XLU) instead of an XLA transpose through HBM.
    x_sc = jnp.transpose(x_cs)                     # (S, C) f32
    xc = x_sc - mean
    var = jnp.sum(xc * xc) * inv_n                 # two-pass (centered) variance
    rstd = jax.lax.rsqrt(var + eps)
    a = gamma_ref[...] * rstd                      # (1, C)
    xn_bf = (xc * a + beta_ref[...]).astype(jnp.bfloat16)     # MXU LHS

    # --- fused QKV projection: one (S, C) @ (C, 3C) bf16 MXU pass -----------
    qkv = jnp.dot(xn_bf, wqkv_ref[...], preferred_element_type=jnp.float32)
    qkv_bf = (qkv + bqkv_ref[...]).astype(jnp.bfloat16)       # (S, 3C)

    # --- per-head attention; head outputs land in lane slices of y_scr ------
    for h in range(n_head):                        # n_head is a static Python int
        lo = h * hd
        qh = qkv_bf[:, lo:lo + hd]                 # (S, hd); hd**-0.5 pre-folded
        kh = qkv_bf[:, C + lo:C + lo + hd]
        vh = qkv_bf[:, 2 * C + lo:2 * C + lo + hd]

        s = jax.lax.dot_general(qh, kh, (((1,), (1,)), ((), ())),
                                preferred_element_type=jnp.float32)   # (S, S) f32
        m = jnp.max(s, axis=-1, keepdims=True)
        p = jnp.exp(s - m)                         # f32, left un-normalized
        denom = jnp.sum(p, axis=-1, keepdims=True)
        yh = jnp.dot(p.astype(jnp.bfloat16), vh,
                     preferred_element_type=jnp.float32)              # (S, hd)
        # Deferred softmax normalization (EUP reciprocal): S*hd mults, not S*S.
        yh = yh * pl.reciprocal(denom, approx=True)
        y_scr[:, lo:lo + hd] = yh.astype(jnp.bfloat16)
    # TODO(synk): for large S, tile the KV axis with an online softmax
    # (flash-style m/l/acc scratch) instead of materializing the (S, S) block.

    # --- single fused out-projection (Scale(0.01) folded into wo/bout) ------
    out = jnp.dot(y_scr[...], wo_ref[...], preferred_element_type=jnp.float32)
    # Residual add, stored back in the (C, S) layout of the output block.
    o_ref[0] = x_cs + jnp.transpose(out + bout_ref[...])
    # TODO(synk): Dropout2d inside SelfAttention2d is identity at inference; not modeled.


def residual_sa(x_nchw, params, *, n_head, eps=1e-5):
    N, C, H, W = x_nchw.shape
    S = H * W
    hd = C // n_head

    # Reshape only (no XLA transpose): kernel works on (1, C, S) blocks.
    x = x_nchw.reshape(N, C, S).astype(jnp.float32)

    gamma = params["gamma"].reshape(1, C).astype(jnp.float32)
    beta = params["beta"].reshape(1, C).astype(jnp.float32)

    # Fold the attention scale hd**-0.5 ( == (hd**-0.25)^2 ) into the Q columns.
    q_scale = hd ** -0.5
    col_scale = jnp.concatenate([jnp.full((C,), q_scale, jnp.float32),
                                 jnp.ones((2 * C,), jnp.float32)])
    wqkv = (params["wqkv"].astype(jnp.float32) * col_scale[None, :]).astype(jnp.bfloat16)
    bqkv = (params["bqkv"].astype(jnp.float32) * col_scale).reshape(1, 3 * C)

    # Fold Scale(0.01) into the out-projection weight and bias.
    out_scale = jnp.asarray(params["scale"], jnp.float32)
    wout = (params["wout"].astype(jnp.float32) * out_scale).astype(jnp.bfloat16)
    bout = (params["bout"].astype(jnp.float32) * out_scale).reshape(1, C)

    kernel = functools.partial(residual_sa_kernel, n_head=n_head, eps=eps)

    # Grid-invariant operands: whole-array VMEM refs (single buffer, no
    # per-grid-step double buffering).
    vmem_spec = pl.BlockSpec(memory_space=pltpu.MemorySpace.VMEM)

    out = pl.pallas_call(
        kernel,
        out_shape=jax.ShapeDtypeStruct((N, C, S), jnp.float32),
        grid=(N,),
        in_specs=[
            pl.BlockSpec((1, C, S), lambda b: (b, 0, 0)),   # x: pipelined per batch element
            vmem_spec,   # gamma (1, C) f32
            vmem_spec,   # beta  (1, C) f32
            vmem_spec,   # Wqkv  (C, 3C) bf16, q-scale folded
            vmem_spec,   # bqkv  (1, 3C) f32, q-scale folded
            vmem_spec,   # Wout  (C, C) bf16, 0.01 folded
            vmem_spec,   # bout  (1, C) f32, 0.01 folded
        ],
        out_specs=pl.BlockSpec((1, C, S), lambda b: (b, 0, 0)),
        scratch_shapes=[pltpu.VMEM((S, C), jnp.bfloat16)],   # per-head context slices
        compiler_params=pltpu.CompilerParams(
            dimension_semantics=("parallel",),
            vmem_limit_bytes=32 * 1024 * 1024),
    )(x, gamma, beta, wqkv, bqkv, wout, bout)

    return out.reshape(N, C, H, W)


def residual_sa_reference(x_nchw, params, *, n_head, eps=1e-5):
    """Pure-JAX reference matching the PyTorch forward."""
    N, C, H, W = x_nchw.shape
    S = H * W
    hd = C // n_head
    x = x_nchw.reshape(N, C, S).transpose(0, 2, 1)                       # (N, S, C)
    mean = x.mean(axis=(1, 2), keepdims=True)
    var = x.var(axis=(1, 2), keepdims=True)
    xn = (x - mean) / jnp.sqrt(var + eps) * params["gamma"] + params["beta"]
    qkv = xn @ params["wqkv"] + params["bqkv"]
    q, k, v = qkv[..., :C], qkv[..., C:2 * C], qkv[..., 2 * C:]
    split = lambda t: t.reshape(N, S, n_head, hd).transpose(0, 2, 1, 3)
    q, k, v = split(q), split(k), split(v)
    sc = hd ** -0.25
    att = jax.nn.softmax((q * sc) @ jnp.swapaxes(k * sc, -1, -2), axis=-1)
    y = (att @ v).transpose(0, 2, 1, 3).reshape(N, S, C)
    out = y @ params["wout"] + params["bout"]
    res = x + params["scale"] * out
    return res.transpose(0, 2, 1).reshape(N, C, H, W)


if __name__ == "__main__":
    # ch must be a multiple of 32 (n_head = ch // 32).  Use ch=64 -> 2 heads of
    # dim 32, 8x8 spatial.  (Toy shape; production C>=128 / larger S is the
    # lane-dense regime this kernel is tiled for.)
    N, C, H, W = 2, 64, 8, 8
    n_head = C // 32

    key = jax.random.PRNGKey(0)
    kx, kwq, kbq, kwo, kbo, kg, kb = jax.random.split(key, 7)

    x = jax.random.normal(kx, (N, C, H, W), jnp.float32)

    params = {
        # GroupNorm affine
        "gamma": 1.0 + 0.1 * jax.random.normal(kg, (C,), jnp.float32),
        "beta": 0.1 * jax.random.normal(kb, (C,), jnp.float32),
        # qkv 1x1 conv: stored as (C_in, 3C_out) matmul weight
        "wqkv": 0.05 * jax.random.normal(kwq, (C, 3 * C), jnp.float32),
        "bqkv": 0.05 * jax.random.normal(kbq, (3 * C,), jnp.float32),
        # out 1x1 conv
        "wout": 0.05 * jax.random.normal(kwo, (C, C), jnp.float32),
        "bout": 0.05 * jax.random.normal(kbo, (C,), jnp.float32),
        # Scale(0.01)
        "scale": jnp.float32(0.01),
    }

    y = residual_sa(x, params, n_head=n_head)
    y = jax.block_until_ready(y)

    y_ref = residual_sa_reference(x, params, n_head=n_head)
    assert y.shape == (N, C, H, W)
    assert jnp.allclose(y, y_ref, atol=2e-2, rtol=2e-2), "mismatch vs reference"

    print("KERNEL_OK")
</pallas_src>

<mosaic_0001>
module attributes {stable_mosaic.version = 11 : i64} {
  func.func @residual_sa_kernel(%arg0: i32, %arg1: memref<1x64x64xf32, #tpu.memory_space<vmem>>, %arg2: memref<1x64xf32, #tpu.memory_space<vmem>>, %arg3: memref<1x64xf32, #tpu.memory_space<vmem>>, %arg4: memref<64x192xbf16, #tpu.memory_space<vmem>>, %arg5: memref<1x192xf32, #tpu.memory_space<vmem>>, %arg6: memref<64x64xbf16, #tpu.memory_space<vmem>>, %arg7: memref<1x64xf32, #tpu.memory_space<vmem>>, %arg8: memref<1x64x64xf32, #tpu.memory_space<vmem>>, %arg9: memref<64x64xbf16, #tpu.memory_space<vmem>>) attributes {dimension_semantics = [#tpu.dimension_semantics<parallel>], iteration_bounds = array<i64: 2>, scalar_prefetch = 0 : i64, scratch_operands = 1 : i64, tpu.core_type = #tpu.core_type<tc>, window_params = [{transform_indices = @transform_0, window_bounds = array<i64: 1, 64, 64>}, {pipeline_mode = #tpu.pipeline_mode<synchronous>, transform_indices = @transform_1, window_bounds = array<i64: 1, 64>}, {pipeline_mode = #tpu.pipeline_mode<synchronous>, transform_indices = @transform_2, window_bounds = array<i64: 1, 64>}, {pipeline_mode = #tpu.pipeline_mode<synchronous>, transform_indices = @transform_3, window_bounds = array<i64: 64, 192>}, {pipeline_mode = #tpu.pipeline_mode<synchronous>, transform_indices = @transform_4, window_bounds = array<i64: 1, 192>}, {pipeline_mode = #tpu.pipeline_mode<synchronous>, transform_indices = @transform_5, window_bounds = array<i64: 64, 64>}, {pipeline_mode = #tpu.pipeline_mode<synchronous>, transform_indices = @transform_6, window_bounds = array<i64: 1, 64>}, {transform_indices = @transform_7, window_bounds = array<i64: 1, 64, 64>}]} {
    %c0 = arith.constant 0 : index
    %c0_0 = arith.constant 0 : index
    %c0_1 = arith.constant 0 : index
    %0 = vector.load %arg1[%c0, %c0_0, %c0_1] : memref<1x64x64xf32, #tpu.memory_space<vmem>>, vector<1x64x64xf32>
    %1 = vector.shape_cast %0 : vector<1x64x64xf32> to vector<64x64xf32>
    %2 = vector.shape_cast %1 : vector<64x64xf32> to vector<1x64x64xf32>
    %cst = arith.constant dense<0.000000e+00> : vector<1xf32>
    %3 = vector.multi_reduction <add>, %2, %cst [1, 2] : vector<1x64x64xf32> to vector<1xf32>
    %4 = vector.shape_cast %3 : vector<1xf32> to vector<1x1x1xf32>
    %5 = vector.extract %4[0, 0, 0] : f32 from vector<1x1x1xf32>
    %cst_2 = arith.constant 2.44140625E-4 : f32
    %6 = arith.mulf %5, %cst_2 : f32
    %7 = tpu.transpose %1, [1, 0] : vector<64x64xf32> -> vector<64x64xf32>
    %8 = vector.broadcast %6 : f32 to vector<64x64xf32>
    %9 = arith.subf %7, %8 : vector<64x64xf32>
    %10 = arith.mulf %9, %9 : vector<64x64xf32>
    %11 = vector.shape_cast %10 : vector<64x64xf32> to vector<1x64x64xf32>
    %cst_3 = arith.constant dense<0.000000e+00> : vector<1xf32>
    %12 = vector.multi_reduction <add>, %11, %cst_3 [1, 2] : vector<1x64x64xf32> to vector<1xf32>
    %13 = vector.shape_cast %12 : vector<1xf32> to vector<1x1x1xf32>
    %14 = vector.extract %13[0, 0, 0] : f32 from vector<1x1x1xf32>
    %cst_4 = arith.constant 2.44140625E-4 : f32
    %15 = arith.mulf %14, %cst_4 : f32
    %cst_5 = arith.constant 9.99999974E-6 : f32
    %16 = arith.addf %15, %cst_5 : f32
    %17 = math.rsqrt %16 : f32
    %c0_6 = arith.constant 0 : index
    %c0_7 = arith.constant 0 : index
    %18 = vector.load %arg2[%c0_6, %c0_7] : memref<1x64xf32, #tpu.memory_space<vmem>>, vector<1x64xf32>
    %19 = vector.broadcast %17 : f32 to vector<1x64xf32>
    %20 = arith.mulf %18, %19 : vector<1x64xf32>
    %21 = vector.broadcast %20 : vector<1x64xf32> to vector<64x64xf32>
    %22 = arith.mulf %9, %21 : vector<64x64xf32>
    %c0_8 = arith.constant 0 : index
    %c0_9 = arith.constant 0 : index
    %23 = vector.load %arg3[%c0_8, %c0_9] : memref<1x64xf32, #tpu.memory_space<vmem>>, vector<1x64xf32>
    %24 = vector.broadcast %23 : vector<1x64xf32> to vector<64x64xf32>
    %25 = arith.addf %22, %24 : vector<64x64xf32>
    %26 = arith.truncf %25 : vector<64x64xf32> to vector<64x64xbf16>
    %c0_10 = arith.constant 0 : index
    %c0_11 = arith.constant 0 : index
    %27 = vector.load %arg4[%c0_10, %c0_11] : memref<64x192xbf16, #tpu.memory_space<vmem>>, vector<64x192xbf16>
    %cst_12 = arith.constant dense<0.000000e+00> : vector<64x192xf32>
    %28 = tpu.matmul %26, %27, %cst_12 {dimension_numbers = #tpu.dot_dimension_numbers<[1], [0], [0], [1], [0, 0, 1, 1], [], []>} : vector<64x64xbf16>, vector<64x192xbf16>, vector<64x192xf32> -> vector<64x192xf32>
    %c0_13 = arith.constant 0 : index
    %c0_14 = arith.constant 0 : index
    %29 = vector.load %arg5[%c0_13, %c0_14] : memref<1x192xf32, #tpu.memory_space<vmem>>, vector<1x192xf32>
    %30 = vector.broadcast %29 : vector<1x192xf32> to vector<64x192xf32>
    %31 = arith.addf %28, %30 : vector<64x192xf32>
    %32 = arith.truncf %31 : vector<64x192xf32> to vector<64x192xbf16>
    %33 = vector.extract_strided_slice %32 {offsets = [0, 0], sizes = [64, 32], strides = [1, 1]} : vector<64x192xbf16> to vector<64x32xbf16>
    %34 = vector.extract_strided_slice %32 {offsets = [0, 64], sizes = [64, 32], strides = [1, 1]} : vector<64x192xbf16> to vector<64x32xbf16>
    %35 = vector.extract_strided_slice %32 {offsets = [0, 128], sizes = [64, 32], strides = [1, 1]} : vector<64x192xbf16> to vector<64x32xbf16>
    %cst_15 = arith.constant dense<0.000000e+00> : vector<64x64xf32>
    %36 = tpu.matmul %33, %34, %cst_15 {dimension_numbers = #tpu.dot_dimension_numbers<[1], [1], [0], [0], [0, 0, 1, 0], [], []>} : vector<64x32xbf16>, vector<64x32xbf16>, vector<64x64xf32> -> vector<64x64xf32>
    %cst_16 = arith.constant dense<0xFF800000> : vector<64xf32>
    %37 = vector.multi_reduction <maximumf>, %36, %cst_16 [1] : vector<64x64xf32> to vector<64xf32>
    %38 = vector.shape_cast %37 : vector<64xf32> to vector<64x1xf32>
    %39 = vector.broadcast %38 : vector<64x1xf32> to vector<64x64xf32>
    %40 = arith.subf %36, %39 : vector<64x64xf32>
    %41 = math.exp %40 : vector<64x64xf32>
    %cst_17 = arith.constant dense<0.000000e+00> : vector<64xf32>
    %42 = vector.multi_reduction <add>, %41, %cst_17 [1] : vector<64x64xf32> to vector<64xf32>
    %43 = vector.shape_cast %42 : vector<64xf32> to vector<64x1xf32>
    %44 = arith.truncf %41 : vector<64x64xf32> to vector<64x64xbf16>
    %cst_18 = arith.constant dense<0.000000e+00> : vector<64x32xf32>
    %45 = tpu.matmul %44, %35, %cst_18 {dimension_numbers = #tpu.dot_dimension_numbers<[1], [0], [0], [1], [0, 0, 1, 1], [], []>} : vector<64x64xbf16>, vector<64x32xbf16>, vector<64x32xf32> -> vector<64x32xf32>
    %46 = tpu.reciprocal %43 {approx = true} : vector<64x1xf32> -> vector<64x1xf32>
    %47 = vector.broadcast %46 : vector<64x1xf32> to vector<64x32xf32>
    %48 = arith.mulf %45, %47 : vector<64x32xf32>
    %49 = arith.truncf %48 : vector<64x32xf32> to vector<64x32xbf16>
    %c0_19 = arith.constant 0 : index
    %c0_20 = arith.constant 0 : index
    %50 = vector.load %arg9[%c0_19, %c0_20] : memref<64x64xbf16, #tpu.memory_space<vmem>>, vector<64x32xbf16>
    tpu.vector_store %arg9[%c0_19, %c0_20], %49 {strides = array<i32>} : memref<64x64xbf16, #tpu.memory_space<vmem>>, vector<64x32xbf16>,
    %51 = vector.extract_strided_slice %32 {offsets = [0, 32], sizes = [64, 32], strides = [1, 1]} : vector<64x192xbf16> to vector<64x32xbf16>
    %52 = vector.extract_strided_slice %32 {offsets = [0, 96], sizes = [64, 32], strides = [1, 1]} : vector<64x192xbf16> to vector<64x32xbf16>
    %53 = vector.extract_strided_slice %32 {offsets = [0, 160], sizes = [64, 32], strides = [1, 1]} : vector<64x192xbf16> to vector<64x32xbf16>
    %cst_21 = arith.constant dense<0.000000e+00> : vector<64x64xf32>
    %54 = tpu.matmul %51, %52, %cst_21 {dimension_numbers = #tpu.dot_dimension_numbers<[1], [1], [0], [0], [0, 0, 1, 0], [], []>} : vector<64x32xbf16>, vector<64x32xbf16>, vector<64x64xf32> -> vector<64x64xf32>
    %cst_22 = arith.constant dense<0xFF800000> : vector<64xf32>
    %55 = vector.multi_reduction <maximumf>, %54, %cst_22 [1] : vector<64x64xf32> to vector<64xf32>
    %56 = vector.shape_cast %55 : vector<64xf32> to vector<64x1xf32>
    %57 = vector.broadcast %56 : vector<64x1xf32> to vector<64x64xf32>
    %58 = arith.subf %54, %57 : vector<64x64xf32>
    %59 = math.exp %58 : vector<64x64xf32>
    %cst_23 = arith.constant dense<0.000000e+00> : vector<64xf32>
    %60 = vector.multi_reduction <add>, %59, %cst_23 [1] : vector<64x64xf32> to vector<64xf32>
    %61 = vector.shape_cast %60 : vector<64xf32> to vector<64x1xf32>
    %62 = arith.truncf %59 : vector<64x64xf32> to vector<64x64xbf16>
    %cst_24 = arith.constant dense<0.000000e+00> : vector<64x32xf32>
    %63 = tpu.matmul %62, %53, %cst_24 {dimension_numbers = #tpu.dot_dimension_numbers<[1], [0], [0], [1], [0, 0, 1, 1], [], []>} : vector<64x64xbf16>, vector<64x32xbf16>, vector<64x32xf32> -> vector<64x32xf32>
    %64 = tpu.reciprocal %61 {approx = true} : vector<64x1xf32> -> vector<64x1xf32>
    %65 = vector.broadcast %64 : vector<64x1xf32> to vector<64x32xf32>
    %66 = arith.mulf %63, %65 : vector<64x32xf32>
    %67 = arith.truncf %66 : vector<64x32xf32> to vector<64x32xbf16>
    %c0_25 = arith.constant 0 : index
    %c32 = arith.constant 32 : index
    %68 = vector.load %arg9[%c0_25, %c32] : memref<64x64xbf16, #tpu.memory_space<vmem>>, vector<64x32xbf16>
    tpu.vector_store %arg9[%c0_25, %c32], %67 {strides = array<i32>} : memref<64x64xbf16, #tpu.memory_space<vmem>>, vector<64x32xbf16>,
    %c0_26 = arith.constant 0 : index
    %c0_27 = arith.constant 0 : index
    %69 = vector.load %arg9[%c0_26, %c0_27] : memref<64x64xbf16, #tpu.memory_space<vmem>>, vector<64x64xbf16>
    %c0_28 = arith.constant 0 : index
    %c0_29 = arith.constant 0 : index
    %70 = vector.load %arg6[%c0_28, %c0_29] : memref<64x64xbf16, #tpu.memory_space<vmem>>, vector<64x64xbf16>
    %cst_30 = arith.constant dense<0.000000e+00> : vector<64x64xf32>
    %71 = tpu.matmul %69, %70, %cst_30 {dimension_numbers = #tpu.dot_dimension_numbers<[1], [0], [0], [1], [0, 0, 1, 1], [], []>} : vector<64x64xbf16>, vector<64x64xbf16>, vector<64x64xf32> -> vector<64x64xf32>
    %c0_31 = arith.constant 0 : index
    %c0_32 = arith.constant 0 : index
    %72 = vector.load %arg7[%c0_31, %c0_32] : memref<1x64xf32, #tpu.memory_space<vmem>>, vector<1x64xf32>
    %73 = vector.broadcast %72 : vector<1x64xf32> to vector<64x64xf32>
    %74 = arith.addf %71, %73 : vector<64x64xf32>
    %75 = tpu.transpose %74, [1, 0] : vector<64x64xf32> -> vector<64x64xf32>
    %76 = arith.addf %1, %75 : vector<64x64xf32>
    %c0_33 = arith.constant 0 : index
    %c0_34 = arith.constant 0 : index
    %c0_35 = arith.constant 0 : index
    %77 = vector.load %arg8[%c0_33, %c0_34, %c0_35] : memref<1x64x64xf32, #tpu.memory_space<vmem>>, vector<1x64x64xf32>
    %78 = vector.shape_cast %77 : vector<1x64x64xf32> to vector<64x64xf32>
    %79 = vector.shape_cast %76 : vector<64x64xf32> to vector<1x64x64xf32>
    tpu.vector_store %arg8[%c0_33, %c0_34, %c0_35], %79 {strides = array<i32>} : memref<1x64x64xf32, #tpu.memory_space<vmem>>, vector<1x64x64xf32>,
    return
  }
  func.func @transform_0(%arg0: i32) -> (i32, i32, i32) {
    %c0_i32 = arith.constant 0 : i32
    %c0_i32_0 = arith.constant 0 : i32
    %c0_i32_1 = arith.constant 0 : i32
    return %arg0, %c0_i32, %c0_i32_0 : i32, i32, i32
  }
  func.func @transform_1(%arg0: i32) -> (i32, i32) {
    %c0_i32 = arith.constant 0 : i32
    %c0_i32_0 = arith.constant 0 : i32
    %c0_i32_1 = arith.constant 0 : i32
    return %c0_i32, %c0_i32_0 : i32, i32
  }
  func.func @transform_2(%arg0: i32) -> (i32, i32) {
    %c0_i32 = arith.constant 0 : i32
    %c0_i32_0 = arith.constant 0 : i32
    %c0_i32_1 = arith.constant 0 : i32
    return %c0_i32, %c0_i32_0 : i32, i32
  }
  func.func @transform_3(%arg0: i32) -> (i32, i32) {
    %c0_i32 = arith.constant 0 : i32
    %c0_i32_0 = arith.constant 0 : i32
    %c0_i32_1 = arith.constant 0 : i32
    return %c0_i32, %c0_i32_0 : i32, i32
  }
  func.func @transform_4(%arg0: i32) -> (i32, i32) {
    %c0_i32 = arith.constant 0 : i32
    %c0_i32_0 = arith.constant 0 : i32
    %c0_i32_1 = arith.constant 0 : i32
    return %c0_i32, %c0_i32_0 : i32, i32
  }
  func.func @transform_5(%arg0: i32) -> (i32, i32) {
    %c0_i32 = arith.constant 0 : i32
    %c0_i32_0 = arith.constant 0 : i32
    %c0_i32_1 = arith.constant 0 : i32
    return %c0_i32, %c0_i32_0 : i32, i32
  }
  func.func @transform_6(%arg0: i32) -> (i32, i32) {
    %c0_i32 = arith.constant 0 : i32
    %c0_i32_0 = arith.constant 0 : i32
    %c0_i32_1 = arith.constant 0 : i32
    return %c0_i32, %c0_i32_0 : i32, i32
  }
  func.func @transform_7(%arg0: i32) -> (i32, i32, i32) {
    %c0_i32 = arith.constant 0 : i32
    %c0_i32_0 = arith.constant 0 : i32
    %c0_i32_1 = arith.constant 0 : i32
    return %arg0, %c0_i32, %c0_i32_0 : i32, i32, i32
  }
}

</mosaic_0001>

<bundles_post_ra>
// kernel: tpu_custom_call.1
= control target key start
LH: loop header
LB: loop body
LE: loop exit
PB: predicated region body
PF: predicated region fallthrough
CT: control target
= control target key end

     0   :  { %s2800_s0 = inlined_call_operand.hbm [shape: f32[2,64,64], index: 0, kind: input, shape index: {}]   ;;  %s2801_s1 = inlined_call_operand.vmem [shape: f32[1,64], index: 1, kind: input, shape index: {}]   ;;  %s2802_s2 = inlined_call_operand.hbm [shape: f32[1,64], index: 2, kind: input, shape index: {}]   ;;  %s2803_s3 = inlined_call_operand.hbm [shape: bf16[64,192], index: 3, kind: input, shape index: {}]   ;;  %s2804_s4 = inlined_call_operand.vmem [shape: f32[1,192], index: 4, kind: input, shape index: {}]   ;;  %s2805_s5 = inlined_call_operand.hbm [shape: bf16[64,64], index: 5, kind: input, shape index: {}]   ;;  %s2806_s6 = inlined_call_operand.vmem [shape: f32[1,64], index: 6, kind: input, shape index: {}]   ;;  %s2807_s7 = inlined_call_operand.hbm [shape: f32[2,64,64], index: 7, kind: output, shape index: {}]  }
   0x1   :  { %2814 = sst [smem:[#allocation16_spill]] %s2802_s2 }
   0x2   :  { %12 = vsyncpa [#allocation4], 0 }
   0x3   :  { %14 = vsyncpa [#allocation4 + $0x1], 0 }
   0x4   :  { %15 = vsyncpa [#allocation7], 0 }
   0x5   :  { %16 = vsyncpa [#allocation10], 0 }
   0x6   :  { %17 = vsyncpa [#allocation5], 0 }
   0x7   :  { %19 = vsyncpa [#allocation5 + $0x1], 0  ;;  %s2263_s24 = smov 0   ;;  %s2265_s25 = smov 0  }
   0x8   :  { %s2267_s26 = smov 0   ;;  %s2269_s27 = smov 0  }
   0x9 LB: > { %s2284_s28 = sadd.s32 4294967295, %s2206_s27   ;;  %s1608_s29 = sadd.s32 4294967294, %s2206_s27   ;;  %s2206_s27 = sphi %s2269_s27, %s2836_s27   ;;  %s2202_s26 = sphi %s2267_s26, %s2835_s26   ;;  %s2198_s25 = sphi %s2265_s25, %s2834_s25   ;;  %s2194_s24 = sphi %s2263_s24, %s2833_s24  }
   0xa   : > { %p45_p0 = scmp.ne.s32.totalorder %s2198_s25, %s2194_s24  ;;  %p2808_p1 = scmp.eq.s32.totalorder %s2284_s28, 0 }
   0xb   : > { %p195_p2 = scmp.eq.s32.totalorder %s2284_s28, 1  ;;  %p201_p3 = scmp.eq.s32.totalorder %s1608_s29, 1 }
   0xc   : > { %p2293_p4 = por %p2808_p1, %p45_p0  ;;  %p1609_p5 = scmp.ge.s32.totalorder %s2206_s27, 1 }
   0xd   : > { %p2298_p6 = por %p201_p3, %p45_p0  ;;  %p208_p7 = scmp.lt.s32.totalorder %s2206_s27, 3 }
   0xe   : > { %s2815_s30 = scalar_select %p2293_p4, 1, 0 }
   0xf   : > { %s2816_s8 = scalar_select %p2298_p6, 1, 0 }
  0x10   : > { %p2303_p8 = pnand %p1609_p5, %p208_p7  ;;  %s2208_s10 = smov [#allocation6]  }
  0x11   : > { %s224_s11 = sshll.u32 %s2208_s10, 4  ;;  %s2209_s12 = smov [#allocation8]   ;;  %s225_s11 = int_to_ptr.vmem [resolvable:$true] %s224_s11 }
  0x12   : > { %s2817_s9 = scalar_select %p2303_p8, 1, 0 }
  0x13   : > { %p1862_p10 = pneg %p2303_p8  ;;  %s234_s13 = sshll.u32 %s2209_s12, 4  ;;  %s2316_s13 = int_to_ptr.vmem [resolvable:$true] %s234_s13 }
  0x14   : > { %s2210_s15 = smov [#allocation9]   ;;  %s2039_s17 = scalar_lea.vmem %s225_s11, 16 }
  0x15   : > { %p2312_p11 = pnand %p1862_p10, %p2808_p1  ;;  %s250_s16 = sshll.u32 %s2210_s15, 4  ;;  %s251_s16 = int_to_ptr.vmem [resolvable:$true] %s250_s16 }
  0x16   : > { %p2040_p13 = scmp.ne.s32.totalorder %s225_s11, %s2039_s17  ;;  %s2046_s18 = scalar_lea.vmem %s225_s11, 32 }
  0x17   : > { %p2030_p12 = pneg %p2312_p11  ;;  %p2047_p5 = scmp.lt.s32.totalorder %s225_s11, %s225_s11 }
  0x18   : > { %p2048_p7 = scmp.lt.s32.totalorder %s2046_s18, %s2039_s17 }
  0x19   : > { %p2042_p0 = pnand %p2040_p13, %p2030_p12 }
  0x1a   : > { %p2049_p10 = por %p2048_p7, %p2047_p5 }
  0x1b   : > { %p2043_p3 = pneg %p2042_p0 }
  0x1d   : > { %p2050_p9 = pnand %p2049_p10, %p2043_p3 }
  0x1f   : > { %2053 = shalt.err (!%p2050_p9)
}
  0x20   : > { %s2819_s2 = sld [smem:[#allocation16_spill]]  ;;  %s2065_s21 = scalar_lea.vmem %s2316_s13, 1024 }
  0x21   : > { %p2066_p1 = scmp.ne.s32.totalorder %s2316_s13, %s2065_s21  ;;  %p2073_p5 = scmp.lt.s32.totalorder %s2316_s13, %s2316_s13 }
  0x22   : > { %p2074_p3 = scmp.lt.s32.totalorder %s2065_s21, %s2065_s21 }
  0x23   : > { %p2068_p13 = pnand %p2066_p1, %p2030_p12 }
  0x24   : > { %p2075_p9 = por %p2074_p3, %p2073_p5 }
  0x25   : > { %p2069_p0 = pneg %p2068_p13 }
  0x26   : > { %1865 = dma.hbm_to_vmem [thread:$0]  (!%p2312_p11), %s2819_s2, 16, %s225_s11, [#allocation7]  }
  0x27   : > { %p2076_p7 = pnand %p2075_p9, %p2069_p0 }
  0x29   : > { %2079 = shalt.err (!%p2076_p7)
}
  0x2a   : > { %s2809_s22 = smov 128   ;;  %s2810_s23 = smov 8  }
  0x2b   : > { %1868 = dma.hbm_to_vmem [thread:$0]  (!%p2312_p11), %s2803_s3, 1024, %s2316_s13, [#allocation7], %s2809_s22, %s2809_s22, %s2810_s23  }
  0x2c   : > { %s2091_s11 = scalar_lea.vmem %s251_s16, 512  ;;  %p2099_p0 = scmp.lt.s32.totalorder %s251_s16, %s251_s16 }
  0x2d   : > { %p2092_p1 = scmp.ne.s32.totalorder %s251_s16, %s2091_s11  ;;  %p2100_p5 = scmp.lt.s32.totalorder %s2091_s11, %s2091_s11 }
  0x2f   : > { %p2094_p10 = pnand %p2092_p1, %p2030_p12  ;;  %p2101_p3 = por %p2100_p5, %p2099_p0 }
  0x31   : > { %p2095_p13 = pneg %p2094_p10 }
  0x33   : > { %p2102_p9 = pnand %p2101_p3, %p2095_p13 }
  0x35   : > { %2105 = shalt.err (!%p2102_p9)
}
  0x36   : > { %s2213_s12 = smov 64   ;;  %s2214_s13 = smov 4  }
  0x37   : > { %1871 = dma.hbm_to_vmem [thread:$0]  (!%p2312_p11), %s2805_s5, 512, %s251_s16, [#allocation10], %s2213_s12, %s2213_s12, %s2214_s13  }
  0x38   : > { %s2353_s18 = sadd.s32 1, %s2206_s27   ;;  %s32_s20 = sadd.s32 1, %s2202_s26 }
  0x39   : > { %s29_s19 = ssub.s32 %s2206_s27, %s2353_s18  ;;  %p39_p7 = scmp.ne.s32.totalorder %s2202_s26, %s2198_s25 }
  0x3a   : > { %p30_p12 = scmp.eq.s32.totalorder %s29_s19, 0  ;;  %p40_p1 = scmp.eq.s32.totalorder %s2206_s27, 0 }
  0x3b   : > { %p1883_p10 = scmp.lt.s32.totalorder %s2206_s27, 2  ;;  %p2367_p0 = por %p195_p2, %p39_p7 }
  0x3c   : > { %s2363_s21 = scalar_select %p30_p12, %s2202_s26, %s32_s20  }
  0x3d   : > { %p41_p13 = por %p40_p1, %p39_p7  ;;  %s267_s14 = sand.u32 1, %s2202_s26  }
  0x3e   : > { %s2820_s29 = scalar_select %p2367_p0, 1, 0 }
  0x3f   : > { %s1686_s10 = sshll.u32 %s2206_s27, 10  ;;  %s1614_s16 = sshll.u32 %s267_s14, 6 }
  0x40   : > { %s2376_s13 = scalar_lea.hbm %s2800_s0, %s1686_s10  ;;  %s271_s15 = scalar_lea.vmem [#allocation3], %s1614_s16 }
  0x41   : > { %s278_s17 = sshll.u32 %s271_s15, 4  ;;  %p2378_p11 = pnand %p1883_p10, %p41_p13  ;;  %s2382_s17 = int_to_ptr.vmem [resolvable:$true] %s278_s17 }
  0x42   : > { %s2384_s20 = scalar_lea.sflag [#allocation4], %s267_s14  ;;  %s2106_s22 = scalar_lea.hbm %s2376_s13, 1024 }
  0x43   : > { %p2107_p2 = scmp.ne.s32.totalorder %s2376_s13, %s2106_s22  ;;  %p2108_p5 = pneg %p2378_p11 }
  0x44   : > { %s2111_s16 = scalar_lea.hbm %s2800_s0, 2048  ;;  %p2112_p12 = scmp.lt.s32.totalorder %s2376_s13, %s2800_s0 }
  0x45   : > { %p2109_p3 = pnand %p2108_p5, %p2107_p2  ;;  %p2113_p7 = scmp.lt.s32.totalorder %s2111_s16, %s2106_s22 }
  0x47   : > { %p2110_p9 = pneg %p2109_p3  ;;  %p2114_p1 = por %p2113_p7, %p2112_p12 }
  0x49   : > { %p2115_p10 = pnand %p2114_p1, %p2110_p9 }
  0x4b   : > { %2118 = shalt.err (!%p2115_p10)
}
  0x4c   : > { %s2119_s14 = scalar_lea.vmem %s2382_s17, 1024  ;;  %s2215_s23 = smov [#allocation3]  }
  0x4d   : > { %p2120_p13 = scmp.ne.s32.totalorder %s2382_s17, %s2119_s14  ;;  %s2124_s2 = sshll.u32 %s2215_s23, 4  ;;  %s2125_s2 = int_to_ptr.vmem [resolvable:$false] %s2124_s2 }
  0x4e   : > { %s2126_s10 = scalar_lea.vmem %s2125_s2, 2048  ;;  %p2127_p3 = scmp.lt.s32.totalorder %s2382_s17, %s2125_s2 }
  0x4f   : > { %p2122_p6 = pnand %p2120_p13, %p2108_p5  ;;  %p2128_p0 = scmp.lt.s32.totalorder %s2126_s10, %s2119_s14 }
  0x51   : > { %p2123_p2 = pneg %p2122_p6  ;;  %p2129_p4 = por %p2128_p0, %p2127_p3 }
  0x53   : > { %p2130_p8 = pnand %p2129_p4, %p2123_p2 }
  0x55   : > { %2133 = shalt.err (!%p2130_p8)
}
  0x56   : > { %s2822_s22 = smov 8   ;;  %s2823_s11 = smov 128  }
  0x57   : > { %1875 = dma.hbm_to_vmem [thread:$0]  (!%p2378_p11), %s2376_s13, 1024, %s2382_s17, %s2384_s20, %s2823_s11, %s2823_s11, %s2822_s22  }
  0x58   : > { %p2824_p6 = scmp.ne.s32.totalorder %s2817_s9, 0 }
  0x59   : > { %s2411_s23 = sand.u32 (!%p2824_p6), 1, %s2198_s25   ;;  %p2825_p4 = scmp.ne.s32.totalorder (!%p2824_p6), %s2815_s30, 0 }
  0x5a   : > { %290 = sbr.rel (%p2824_p6) target bundleno = 2082 (0x822), region = 48  ;;  %s1618_s2 = sshll.u32 (!%p2824_p6), %s2411_s23, 6 }
  0x5b   : > { %s293_s16 = scalar_lea.sflag (!%p2824_p6), [#allocation4], %s2411_s23  ;;  %s2417_s19 = scalar_lea.vmem (!%p2824_p6), [#allocation3], %s1618_s2 }
  0x5f   : > { %2177 = dma.done.wait (%p2825_p4), %s293_s16, 1024  }
  0x60   : > { %2179 = vsyncadd (%p2825_p4), %s293_s16, 4294966272  ;;  %p2826_p8 = scmp.eq.s32.totalorder %s2284_s28, 0 }
  0x62   : > { %2181 = dma.done.wait (%p2826_p8), [#allocation7], 1040   ;;  %p2827_p0 = pmov %p2826_p8 }
  0x64   : > { %2183 = vsyncadd (%p2827_p0), [#allocation7], 4294966256  ;;  %p2828_p11 = pmov %p2827_p0 }
  0x65   : > { %p2829_p5 = pmov %p2827_p0 }
  0x66   : > { %2185 = dma.done.wait (%p2828_p11), [#allocation10], 512  }
  0x67   : > { %2187 = vsyncadd (%p2829_p5), [#allocation10], 4294966784  ;;  %vm348_vm0 = vcmask 523264   ;;  %v340_v0 = vld [vmem:[%s2417_s19] sm:$0xff]  ;;  %v341_v1 = vld [vmem:[%s2417_s19 + $0x8] sm:$0xff]  ;;  %vm653_vm1 = vcmask 261120  }
  0x68   : > { %v342_v2 = vld [vmem:[%s2417_s19 + $0x10] sm:$0xff]  ;;  %v343_v3 = vld [vmem:[%s2417_s19 + $0x18] sm:$0xff]  ;;  %v344_v4 = vld [vmem:[%s2417_s19 + $0x20] sm:$0xff]  ;;  %v349_v5 = vsel %vm348_vm0, %v340_v0, 0.0  ;;  %v350_v6 = vsel %vm348_vm0, %v341_v1, 0.0  ;;  %s2217_s11 = smov 64  }
  0x69   : > { %v352_v7 = vsel %vm348_vm0, %v342_v2, 0.0  ;;  %v345_v8 = vld [vmem:[%s2417_s19 + $0x28] sm:$0xff]  ;;  %v351_v9 = vadd.f32 %v350_v6, %v349_v5  ;;  %v354_v10 = vsel %vm348_vm0, %v343_v3, 0.0  ;;  %v346_v11 = vld [vmem:[%s2417_s19 + $0x30] sm:$0xff]  ;;  %v356_v13 = vsel %vm348_vm0, %v344_v4, 0.0  ;;  %v347_v16 = vld [vmem:[%s2417_s19 + $0x38] sm:$0xff] }
  0x6a   : > { %v358_v14 = vsel %vm348_vm0, %v345_v8, 0.0  ;;  %v360_v18 = vsel %vm348_vm0, %v346_v11, 0.0  ;;  %v362_v20 = vsel %vm348_vm0, %v347_v16, 0.0  ;;  %v1934_v6 = vld [vmem:[#allocation8 + $0x34] ss:$8 sps:$4 sm:$0xff]   ;;  %s2218_s16 = smov 96  }
  0x6b   : > { %v353_v12 = vadd.f32 %v352_v7, %v351_v9  ;;  %v1936_v7 = vld [vmem:[#allocation8 + $0x30] ss:$8 sps:$4 sm:$0xff]   ;;  %568 = vmatprep.subr.bf16.mxu0 %v1934_v6  ;;  %vm944_vm2 = vcmask 257024   ;;  %vm1291_vm3 = vcmask 519424   ;;  %s1493_s10 = scalar_lea.sflag [#allocation5], %s2411_s23  ;;  %p2830_p12 = scmp.ne.s32.totalorder %s2820_s29, 0 }
  0x6c   : > { %569 = vmatpush1.bf16.msra.mxu0 %v1936_v7  ;;  %s2220_s22 = smov [#allocation11]  }
  0x6d   : > { %v355_v15 = vadd.f32 %v354_v10, %v353_v12  ;;  %v1939_v12 = vld [vmem:[#allocation8 + $0x20] ss:$8 sps:$4 sm:$0xff]  }
  0x6f   : > { %v357_v17 = vadd.f32 %v356_v13, %v355_v15  ;;  %v1940_v15 = vld [vmem:[#allocation8 + $0x14] ss:$8 sps:$4 sm:$0xff]  }
  0x71   : > { %v359_v19 = vadd.f32 %v358_v14, %v357_v17  ;;  %v1943_v17 = vld [vmem:[#allocation8 + $0x4] ss:$8 sps:$4 sm:$0xff]  }
  0x73   : > { %v361_v21 = vadd.f32 %v360_v18, %v359_v19  ;;  %v1945_v19 = vld [vmem:[#allocation8] ss:$8 sps:$4 sm:$0xff]  }
  0x75   : > { %v363_v22 = vadd.f32 %v362_v20, %v361_v21  ;;  %v2216_v20 = vmov 0  }
  0x76   : > { %592 = vmatprep.mubr.bf16.mxu0 %v2216_v20 }
  0x77   : > { %364 = vadd.xlane.f32.xlu0 %v363_v22 }
  0xa4   : > { %374 = vxpose.xlu0.b32.start [1/8] (short) (narrow) %v340_v0, 64 }
  0xa8   : > { %375 = vxpose.xlu0.b32.cont [2/8] (short) (narrow) %v341_v1, 64 }
  0xac   : > { %376 = vxpose.xlu0.b32.cont [3/8] (short) (narrow) %v342_v2, 64 }
  0xb0   : > { %377 = vxpose.xlu0.b32.cont [4/8] (short) (narrow) %v343_v3, 64 }
  0xb4   : > { %378 = vxpose.xlu0.b32.cont [5/8] (short) (narrow) %v344_v4, 64 }
  0xb8   : > { %379 = vxpose.xlu0.b32.cont [6/8] (short) (narrow) %v345_v8, 64 }
  0xbc   : > { %380 = vxpose.xlu0.b32.cont [7/8] (short) (narrow) %v346_v11, 64  ;;  %v1937_v11 = vld [vmem:[#allocation8 + $0x24] ss:$8 sps:$4 sm:$0xff]  }
  0xbd   : > { %570 = vmatprep.subr.bf16.mxu0 %v1937_v11 }
  0xbe   : > { %571 = vmatpush1.bf16.msra.mxu0 %v1939_v12 }
  0xbf   : > { %572 = vmatprep.subr.bf16.mxu0 %v1940_v15 }
  0xc0   : > { %381 = vxpose.xlu0.b32.end [8/8] (short) (narrow) %v347_v16, 64  ;;  %v1942_v16 = vld [vmem:[#allocation8 + $0x10] ss:$8 sps:$4 sm:$0xff]  }
  0xc2   : > { %573 = vmatpush1.bf16.msra.mxu0 %v1942_v16 }
  0xc3   : > { %574 = vmatprep.subr.bf16.mxu0 %v1943_v17 }
  0xc6   : > { %575 = vmatpush1.bf16.msra.mxu0 %v1945_v19 }
 0x100   : > { %v365_v23 = vpop.xlane.xlu0 %364 }
 0x101   : > { %v366_v24 = vrot.slane %v365_v23, 4 }
 0x103   : > { %v367_v25 = vadd.f32 %v366_v24, %v365_v23  ;;  %v456_v24 = vlaneseq }
 0x105   : > { %v368_v26 = vrot.slane %v367_v25, 2 }
 0x107   : > { %v369_v27 = vadd.f32 %v368_v26, %v367_v25  ;;  %v457_v25 = vshrl.u32 %v456_v24, 7  ;;  %v452_v26 = vld [vmem:[%s2801_s1] sm:$0x1] }
 0x109   : > { %v370_v28 = vrot.slane %v369_v27, 1  ;;  %v504_v6 = vsub.s32 1, %v457_v25 }
 0x10b   : > { %v371_v29 = vadd.f32 %v370_v28, %v369_v27  ;;  %v458_v27 = vsub.s32 0, %v457_v25 }
 0x10d   : > { %1840 = vpush %v371_v29 }
 0x120   : > { %v390_v30 = vpop.trf.xlu0 }
 0x124   : > { %v391_v31 = vpop.trf.xlu0 }
 0x128   : > { %v392_v32 = vpop.trf.xlu0 }
 0x12c   : > { %v393_v33 = vpop.trf.xlu0 }
 0x130   : > { %v394_v34 = vpop.trf.xlu0 }
 0x134   : > { %v395_v35 = vpop.trf.xlu0 }
 0x138   : > { %v396_v36 = vpop.trf.xlu0 }
 0x13c   : > { %v397_v50 = vpop.trf.xlu0 }
 0x13e   : > { %s1841_s30 = spop %1840 }
 0x13f   : > { %s373_s9 = smul.f32 0.00024414063, %s1841_s30  ;;  %s2219_s30 = smov 32  }
 0x141   : > { %v406_v37 = vstv %s373_s9 }
 0x142   : > { %v2447_v38 = vsub.f32 %v390_v30, %v406_v37  ;;  %v2449_v39 = vsub.f32 %v391_v31, %v406_v37  ;;  %v2451_v40 = vsub.f32 %v392_v32, %v406_v37  ;;  %v2453_v41 = vsub.f32 %v393_v33, %v406_v37  ;;  %v1623_v31 = vld [vmem:[#allocation6] ss:$0 sm:$0xff] }
 0x143   : > { %v2455_v42 = vsub.f32 %v394_v34, %v406_v37  ;;  %v2463_v46 = vsub.f32 %v395_v35, %v406_v37  ;;  %v2469_v52 = vsub.f32 %v396_v36, %v406_v37  ;;  %v2474_v56 = vsub.f32 %v397_v50, %v406_v37 }
 0x144   : > { %v415_v43 = vmul.f32 %v2447_v38, %v2447_v38  ;;  %v416_v44 = vmul.f32 %v2449_v39, %v2449_v39  ;;  %v417_v45 = vmul.f32 %v2451_v40, %v2451_v40  ;;  %v418_v47 = vmul.f32 %v2453_v41, %v2453_v41 }
 0x145   : > { %v419_v53 = vmul.f32 %v2455_v42, %v2455_v42  ;;  %v420_v57 = vmul.f32 %v2463_v46, %v2463_v46  ;;  %v421_v60 = vmul.f32 %v2469_v52, %v2469_v52  ;;  %v422_v63 = vmul.f32 %v2474_v56, %v2474_v56 }
 0x146   : > { %v423_v48 = vsel %vm348_vm0, %v415_v43, 0.0  ;;  %v424_v49 = vsel %vm348_vm0, %v416_v44, 0.0  ;;  %v426_v54 = vsel %vm348_vm0, %v417_v45, 0.0  ;;  %v428_v58 = vsel %vm348_vm0, %v418_v47, 0.0 }
 0x147   : > { %v425_v51 = vadd.f32 %v424_v49, %v423_v48  ;;  %v430_v61 = vsel %vm348_vm0, %v419_v53, 0.0  ;;  %v432_v0 = vsel %vm348_vm0, %v420_v57, 0.0  ;;  %v434_v2 = vsel %vm348_vm0, %v421_v60, 0.0 }
 0x148   : > { %v436_v4 = vsel %vm348_vm0, %v422_v63, 0.0 }
 0x149   : > { %v427_v55 = vadd.f32 %v426_v54, %v425_v51 }
 0x14b   : > { %v429_v59 = vadd.f32 %v428_v58, %v427_v55 }
 0x14d   : > { %v431_v62 = vadd.f32 %v430_v61, %v429_v59 }
 0x14f   : > { %v433_v1 = vadd.f32 %v432_v0, %v431_v62 }
 0x151   : > { %v435_v3 = vadd.f32 %v434_v2, %v433_v1 }
 0x153   : > { %v437_v5 = vadd.f32 %v436_v4, %v435_v3 }
 0x155   : > { %438 = vadd.xlane.f32.xlu1 %v437_v5 }
 0x1de   : > { %v439_v8 = vpop.xlane.xlu1 %438 }
 0x1df   : > { %v440_v9 = vrot.slane %v439_v8, 4 }
 0x1e1   : > { %v441_v10 = vadd.f32 %v440_v9, %v439_v8 }
 0x1e3   : > { %v442_v13 = vrot.slane %v441_v10, 2 }
 0x1e5   : > { %v443_v14 = vadd.f32 %v442_v13, %v441_v10 }
 0x1e7   : > { %v444_v18 = vrot.slane %v443_v14, 1 }
 0x1e9   : > { %v445_v21 = vadd.f32 %v444_v18, %v443_v14 }
 0x1eb   : > { %1842 = vpush %v445_v21 }
 0x21c   : > { %s1843_s13 = spop %1842 }
 0x21d   : > { %s447_s17 = smul.f32 0.00024414063, %s1843_s13 }
 0x21f   : > { %s448_s20 = sadd.f32 1e-05, %s447_s17  ;;  %s2725_s17 = scalar_lea.vmem [#allocation11], %s1618_s2 }
 0x220   : > { %s1703_s2 = sshll.u32 %s2284_s28, 10 }
 0x221   : > { %v449_v22 = vstv %s448_s20  ;;  %s1506_s20 = sshll.u32 %s2725_s17, 4  ;;  %s2754_s20 = int_to_ptr.vmem [resolvable:$true] %s1506_s20 }
 0x222   : > { %1954 = vrsqrt.f32 %v449_v22  ;;  %s2134_s28 = scalar_lea.vmem %s2754_s20, 1024 }
 0x223   : > { %p2135_p9 = scmp.ne.s32.totalorder %s2754_s20, %s2134_s28 }
 0x225   : > { %p2136_p7 = pnand %p2135_p9, %p2830_p12 }
 0x227   : > { %p2137_p1 = pneg %p2136_p7 }
 0x22f   : > { %v1955_v23 = vpop.eup %1954 }
 0x230   : > { %1844 = vpush %v1955_v23 }
 0x261   : > { %s1845_s14 = spop %1844 }
 0x262   : > { %v453_v28 = vstv %s1845_s14  ;;  %s2752_s14 = scalar_lea.hbm %s2807_s7, %s1703_s2 }
 0x263   : > { %v454_v29 = vmul.f32 %v453_v28, %v452_v26 }
 0x265   : > { %v459_v30 = vrot.slane %v454_v29, %v458_v27 }
 0x267   : > { %v461_v32 = vmul.f32 %v459_v30, %v2447_v38  ;;  %v462_v33 = vmul.f32 %v459_v30, %v2449_v39  ;;  %v463_v37 = vmul.f32 %v459_v30, %v2451_v40  ;;  %v464_v43 = vmul.f32 %v459_v30, %v2453_v41 }
 0x268   : > { %v465_v48 = vmul.f32 %v459_v30, %v2455_v42  ;;  %v466_v49 = vmul.f32 %v459_v30, %v2463_v46  ;;  %v467_v40 = vmul.f32 %v459_v30, %v2469_v52  ;;  %v468_v41 = vmul.f32 %v459_v30, %v2474_v56  ;;  %v496_v42 = vld [vmem:[%s2804_s4] sm:$0x3] }
 0x269   : > { %v476_v34 = vadd.f32 %v1623_v31, %v461_v32  ;;  %v477_v35 = vadd.f32 %v1623_v31, %v462_v33  ;;  %v478_v44 = vadd.f32 %v1623_v31, %v463_v37  ;;  %v479_v45 = vadd.f32 %v1623_v31, %v464_v43 }
 0x26a   : > { %v480_v38 = vadd.f32 %v1623_v31, %v465_v48  ;;  %v481_v39 = vadd.f32 %v1623_v31, %v466_v49  ;;  %v482_v51 = vadd.f32 %v1623_v31, %v467_v40  ;;  %v483_v53 = vadd.f32 %v1623_v31, %v468_v41 }
 0x26b   : > { %v484_v36 = vpack.c.bf16 %v477_v35, %v476_v34  ;;  %v485_v47 = vpack.c.bf16 %v479_v45, %v478_v44  ;;  %v501_v55 = vrot.slane %v496_v42, %v458_v27  ;;  %v505_v9 = vrot.slane %v496_v42, %v504_v6 }
 0x26c   : > { %v486_v50 = vpack.c.bf16 %v481_v39, %v480_v38  ;;  %v487_v54 = vpack.c.bf16 %v483_v53, %v482_v51 }
 0x26d   : > { %1632 = vmatmul.mubr.msk.bf16.vlgmr.msra.gmra.mxu0 %vm348_vm0, %v484_v36 }
 0x26e   : > { %602 = vmatprep.mubr.bf16.mxu0 %v2216_v20 }
 0x275   : > { %1633 = vmatmul.mubr.msk.bf16.gmra.mxu0 %vm348_vm0, %v485_v47 }
 0x276   : > { %612 = vmatprep.mubr.bf16.mxu0 %v2216_v20 }
 0x27d   : > { %1634 = vmatmul.mubr.msk.bf16.gmra.mxu0 %vm348_vm0, %v486_v50 }
 0x27e   : > { %622 = vmatprep.mubr.bf16.mxu0 %v2216_v20 }
 0x285   : > { %1635 = vmatmul.mubr.msk.bf16.gmra.mxu0 %vm348_vm0, %v487_v54 }
 0x32d   : > { %v594_v46 = vpop.f32.mrf.mxu0 }
 0x32e   : > { %v595_v59 = vadd.f32 %v594_v46, %v501_v55 }
 0x32f   : > { %v596_v57 = vpop.f32.mrf.mxu0 }
 0x330   : > { %v597_v30 = vadd.f32 %v596_v57, %v505_v9 }
 0x331   : > { %v598_v58 = vpop.f32.mrf.mxu0 }
 0x332   : > { %v599_v52 = vadd.f32 %v598_v58, %v501_v55 }
 0x333   : > { %v600_v60 = vpop.f32.mrf.mxu0 }
 0x334   : > { %v633_v56 = vpack.c.bf16 %v599_v52, %v595_v59  ;;  %v601_v27 = vadd.f32 %v600_v60, %v505_v9 }
 0x335   : > { %v604_v61 = vpop.f32.mrf.mxu0 }
 0x336   : > { %1752 = vmatprep.mubr.msk.bf16.mxu1 %vm653_vm1, %v633_v56  ;;  %v605_v25 = vadd.f32 %v604_v61, %v501_v55  ;;  %v2513_v31 = vpack.c.bf16 %v601_v27, %v597_v30 }
 0x337   : > { %v606_v62 = vpop.f32.mrf.mxu0 }
 0x338   : > { %v607_v26 = vadd.f32 %v606_v62, %v505_v9 }
 0x339   : > { %v608_v63 = vpop.f32.mrf.mxu0 }
 0x33a   : > { %v609_v21 = vadd.f32 %v608_v63, %v501_v55 }
 0x33b   : > { %v610_v0 = vpop.f32.mrf.mxu0 }
 0x33c   : > { %v611_v22 = vadd.f32 %v610_v0, %v505_v9  ;;  %v635_v28 = vpack.c.bf16 %v609_v21, %v605_v25 }
 0x33d   : > { %v614_v1 = vpop.f32.mrf.mxu0 }
 0x33e   : > { %v615_v18 = vadd.f32 %v614_v1, %v501_v55  ;;  %v2510_v29 = vpack.c.bf16 %v611_v22, %v607_v26 }
 0x33f   : > { %v616_v2 = vpop.f32.mrf.mxu0 }
 0x340   : > { %v617_v19 = vadd.f32 %v616_v2, %v505_v9 }
 0x341   : > { %v618_v3 = vpop.f32.mrf.mxu0 }
 0x342   : > { %v619_v12 = vadd.f32 %v618_v3, %v501_v55 }
 0x343   : > { %v620_v4 = vpop.f32.mrf.mxu0 }
 0x344   : > { %v621_v14 = vadd.f32 %v620_v4, %v505_v9  ;;  %v637_v23 = vpack.c.bf16 %v619_v12, %v615_v18 }
 0x345   : > { %v624_v5 = vpop.f32.mrf.mxu0 }
 0x346   : > { %v625_v10 = vadd.f32 %v624_v5, %v501_v55  ;;  %v638_v24 = vpack.c.bf16 %v621_v14, %v617_v19 }
 0x347   : > { %v626_v7 = vpop.f32.mrf.mxu0 }
 0x348   : > { %v627_v15 = vadd.f32 %v626_v7, %v505_v9 }
 0x349   : > { %v628_v8 = vpop.f32.mrf.mxu0 }
 0x34a   : > { %v629_v11 = vadd.f32 %v628_v8, %v501_v55 }
 0x34b   : > { %v630_v13 = vpop.f32.mrf.mxu0 }
 0x34c   : > { %v2506_v16 = vpack.c.bf16 %v629_v11, %v625_v10  ;;  %v631_v17 = vadd.f32 %v630_v13, %v505_v9 }
 0x34e   : > { %v640_v20 = vpack.c.bf16 %v631_v17, %v627_v15  ;;  %651 = vrot.lane.b32.xlu1 %v2506_v16, %s2217_s11 }
 0x350   : > { %1144 = vrot.lane.b32.xlu0 %v640_v20, %s2218_s16  ;;  %1760 = vmatprep.subr.bf16.mxu0 %v640_v20 }
 0x351   : > { %1761 = vmatpush3.bf16.msra.mxu0 %v640_v20 }
 0x352   : > { %1762 = vmatprep.subr.bf16.mxu0 %v638_v24  ;;  %649 = vrot.lane.b32.xlu1 %v637_v23, %s2217_s11 }
 0x355   : > { %1763 = vmatpush3.bf16.msra.mxu0 %v638_v24 }
 0x356   : > { %1764 = vmatprep.subr.bf16.mxu0 %v2510_v29  ;;  %647 = vrot.lane.b32.xlu1 %v635_v28, %s2217_s11 }
 0x359   : > { %1765 = vmatpush3.bf16.msra.mxu0 %v2510_v29 }
 0x35a   : > { %1766 = vmatprep.subr.bf16.mxu0 %v2513_v31  ;;  %645 = vrot.lane.b32.xlu1 %v633_v56, %s2217_s11  ;;  %s2138_s11 = sshll.u32 %s2220_s22, 4  ;;  %s2139_s11 = int_to_ptr.vmem [resolvable:$false] %s2138_s11 }
 0x35b   : > { %p2141_p10 = scmp.lt.s32.totalorder %s2754_s20, %s2139_s11 }
 0x35d   : > { %1767 = vmatpush3.bf16.msra.mxu0 %v2513_v31 }
 0x35e   : > { %967 = vrot.lane.b32.xlu1 %v2506_v16, %s2219_s30 }
 0x362   : > { %965 = vrot.lane.b32.xlu1 %v637_v23, %s2219_s30 }
 0x366   : > { %963 = vrot.lane.b32.xlu1 %v635_v28, %s2219_s30 }
 0x36a   : > { %961 = vrot.lane.b32.xlu1 %v633_v56, %s2219_s30 }
 0x36e   : > { %953 = vrot.lane.b32.xlu1 %v633_v56, %s2218_s16 }
 0x372   : > { %955 = vrot.lane.b32.xlu1 %v635_v28, %s2218_s16 }
 0x376   : > { %957 = vrot.lane.b32.xlu1 %v637_v23, %s2218_s16 }
 0x37a   : > { %959 = vrot.lane.b32.xlu1 %v2506_v16, %s2218_s16 }
 0x37e   : > { %1142 = vrot.lane.b32.xlu1 %v638_v24, %s2218_s16 }
 0x3c0   : > { %v652_v32 = vpop.permute.xlu1 %651 }
 0x3c1   : > { %1832 = vmatprep.subr.msk.bf16.mxu1 %vm653_vm1, %v652_v32  ;;  %v676_v33 = vsel %vm653_vm1, %v652_v32, 0 }
 0x3c2   : > { %v2531_v34 = vpop.permute.xlu0 %1144  ;;  %1745 = vmatpush3.bf16.xpose.msra.mxu1 %v676_v33 }
 0x3c3   : > { %1792 = vmatprep.subr.bf16.mxu0 %v2531_v34 }
 0x3c4   : > { %v650_v35 = vpop.permute.xlu1 %649 }
 0x3c5   : > { %1833 = vmatprep.subr.msk.bf16.mxu1 %vm653_vm1, %v650_v35  ;;  %v673_v37 = vsel %vm653_vm1, %v650_v35, 0 }
 0x3c8   : > { %v648_v36 = vpop.permute.xlu1 %647 }
 0x3c9   : > { %v670_v45 = vsel %vm653_vm1, %v648_v36, 0 }
 0x3ca   : > { %1747 = vmatpush3.bf16.xpose.msra.mxu1 %v673_v37 }
 0x3cb   : > { %1834 = vmatprep.subr.msk.bf16.mxu1 %vm653_vm1, %v648_v36 }
 0x3cc   : > { %v646_v43 = vpop.permute.xlu1 %645 }
 0x3cd   : > { %v667_v48 = vsel %vm653_vm1, %v646_v43, 0 }
 0x3d0   : > { %v968_v44 = vpop.permute.xlu1 %967 }
 0x3d1   : > { %v991_v38 = vsel %vm653_vm1, %v968_v44, 0 }
 0x3d2   : > { %1749 = vmatpush3.bf16.xpose.msra.mxu1 %v670_v45 }
 0x3d3   : > { %1835 = vmatprep.subr.msk.bf16.mxu1 %vm653_vm1, %v646_v43 }
 0x3d4   : > { %v966_v47 = vpop.permute.xlu1 %965 }
 0x3d5   : > { %v988_v50 = vsel %vm653_vm1, %v966_v47, 0 }
 0x3d8   : > { %v964_v49 = vpop.permute.xlu1 %963 }
 0x3d9   : > { %v985_v41 = vsel %vm653_vm1, %v964_v49, 0 }
 0x3da   : > { %1751 = vmatpush3.bf16.xpose.msra.mxu1 %v667_v48 }
 0x3db   : > { %1836 = vmatprep.subr.msk.bf16.mxu1 %vm653_vm1, %v968_v44 }
 0x3dc   : > { %v962_v39 = vpop.permute.xlu1 %961 }
 0x3dd   : > { %v982_v51 = vsel %vm653_vm1, %v962_v39, 0 }
 0x3e0   : > { %v954_v40 = vpop.permute.xlu1 %953 }
 0x3e1   : > { %1753 = vmatmul.mubr.msk.bf16.vlgmr.msra.gmra.mxu1 %vm653_vm1, %v635_v28 }
 0x3e2   : > { %1756 = vmatprep.mubr.msk.bf16.mxu1 %vm653_vm1, %v637_v23  ;;  %1777 = vmatpush3.bf16.xpose.msra.mxu1 %v991_v38 }
 0x3e3   : > { %1837 = vmatprep.subr.msk.bf16.mxu1 %vm653_vm1, %v966_v47 }
 0x3e4   : > { %v956_v53 = vpop.permute.xlu1 %955 }
 0x3e8   : > { %v958_v54 = vpop.permute.xlu1 %957 }
 0x3e9   : > { %1757 = vmatmul.mubr.msk.bf16.gmra.mxu1 %vm653_vm1, %v2506_v16 }
 0x3ea   : > { %1779 = vmatpush3.bf16.xpose.msra.mxu1 %v988_v50  ;;  %1784 = vmatprep.mubr.msk.bf16.mxu1 %vm653_vm1, %v954_v40 }
 0x3eb   : > { %1838 = vmatprep.subr.msk.bf16.mxu1 %vm653_vm1, %v964_v49 }
 0x3ec   : > { %v960_v42 = vpop.permute.xlu1 %959 }
 0x3f0   : > { %v1143_v21 = vpop.permute.xlu1 %1142 }
 0x3f2   : > { %1781 = vmatpush3.bf16.xpose.msra.mxu1 %v985_v41 }
 0x3f3   : > { %1839 = vmatprep.subr.msk.bf16.mxu1 %vm653_vm1, %v962_v39 }
 0x3fa   : > { %1783 = vmatpush3.bf16.xpose.msra.mxu1 %v982_v51 }
 0x401   : > { %1785 = vmatmul.mubr.msk.bf16.vlgmr.msra.gmra.mxu1 %vm653_vm1, %v956_v53 }
 0x402   : > { %1788 = vmatprep.mubr.msk.bf16.mxu1 %vm653_vm1, %v958_v54 }
 0x409   : > { %1789 = vmatmul.mubr.msk.bf16.gmra.mxu1 %vm653_vm1, %v960_v42 }
 0x4a1   : > { %v1754_v46 = vpop.f32.mrf.mxu1 }
 0x4a2   : > { %v749_v55 = vsel %vm348_vm0, %v1754_v46, -inf }
 0x4a3   : > { %750 = vmax.xlane.f32.xlu1 %v749_v55  ;;  %v712_v57 = vpop.f32.mrf.mxu1 }
 0x4a4   : > { %v743_v59 = vsel %vm348_vm0, %v712_v57, -inf }
 0x4a5   : > { %v1755_v58 = vpop.f32.mrf.mxu1 }
 0x4a6   : > { %v752_v56 = vsel %vm348_vm0, %v1755_v58, -inf }
 0x4a7   : > { %744 = vmax.xlane.f32.xlu1 %v743_v59  ;;  %v715_v52 = vpop.f32.mrf.mxu1 }
 0x4a8   : > { %v746_v60 = vsel %vm348_vm0, %v715_v52, -inf }
 0x4a9   : > { %747 = vmax.xlane.f32.xlu0 %v746_v60  ;;  %v2560_v61 = vpop.f32.mrf.mxu1 }
 0x4aa   : > { %v761_v62 = vsel %vm348_vm0, %v2560_v61, -inf }
 0x4ab   : > { %753 = vmax.xlane.f32.xlu1 %v752_v56  ;;  %v728_v63 = vpop.f32.mrf.mxu1 }
 0x4ac   : > { %v755_v0 = vsel %vm348_vm0, %v728_v63, -inf }
 0x4ad   : > { %v1759_v1 = vpop.f32.mrf.mxu1 }
 0x4ae   : > { %v764_v2 = vsel %vm348_vm0, %v1759_v1, -inf }
 0x4af   : > { %762 = vmax.xlane.f32.xlu1 %v761_v62  ;;  %v2566_v3 = vpop.f32.mrf.mxu1 }
 0x4b0   : > { %v758_v4 = vsel %vm348_vm0, %v2566_v3, -inf }
 0x4b3   : > { %756 = vmax.xlane.f32.xlu1 %v755_v0 }
 0x4b7   : > { %765 = vmax.xlane.f32.xlu1 %v764_v2 }
 0x4bb   : > { %759 = vmax.xlane.f32.xlu1 %v758_v4 }
 0x4c1   : > { %v2570_v5 = vpop.f32.mrf.mxu1 }
 0x4c2   : > { %v1064_v6 = vsel %vm348_vm0, %v2570_v5, -inf }
 0x4c3   : > { %1065 = vmax.xlane.f32.xlu0 %v1064_v6  ;;  %v2574_v7 = vpop.f32.mrf.mxu1 }
 0x4c4   : > { %v1058_v9 = vsel %vm348_vm0, %v2574_v7, -inf }
 0x4c5   : > { %v2576_v8 = vpop.f32.mrf.mxu1 }
 0x4c6   : > { %v1067_v10 = vsel %vm348_vm0, %v2576_v8, -inf }
 0x4c7   : > { %1059 = vmax.xlane.f32.xlu0 %v1058_v9  ;;  %v2582_v11 = vpop.f32.mrf.mxu1  ;;  %1068 = vmax.xlane.f32.xlu1 %v1067_v10 }
 0x4c8   : > { %v1061_v14 = vsel %vm348_vm0, %v2582_v11, -inf }
 0x4c9   : > { %v2584_v12 = vpop.f32.mrf.mxu1 }
 0x4ca   : > { %v1076_v13 = vsel %vm348_vm0, %v2584_v12, -inf }
 0x4cb   : > { %1077 = vmax.xlane.f32.xlu0 %v1076_v13  ;;  %v2590_v15 = vpop.f32.mrf.mxu1  ;;  %1062 = vmax.xlane.f32.xlu1 %v1061_v14 }
 0x4cc   : > { %v1070_v17 = vsel %vm348_vm0, %v2590_v15, -inf }
 0x4cd   : > { %v2592_v16 = vpop.f32.mrf.mxu1 }
 0x4ce   : > { %v1079_v18 = vsel %vm348_vm0, %v2592_v16, -inf }
 0x4cf   : > { %1071 = vmax.xlane.f32.xlu0 %v1070_v17  ;;  %v2598_v19 = vpop.f32.mrf.mxu1  ;;  %1080 = vmax.xlane.f32.xlu1 %v1079_v18 }
 0x4d0   : > { %v1073_v20 = vsel %vm348_vm0, %v2598_v19, -inf }
 0x4d3   : > { %1074 = vmax.xlane.f32.xlu1 %v1073_v20 }
 0x4e4   : > { %1140 = vrot.lane.b32.xlu1 %v2510_v29, %s2218_s16 }
 0x4e5   : > { %1138 = vrot.lane.b32.xlu0 %v2513_v31, %s2218_s16  ;;  %s2140_s16 = scalar_lea.vmem %s2139_s11, 2048 }
 0x4e6   : > { %p2142_p13 = scmp.lt.s32.totalorder %s2140_s16, %s2134_s28 }
 0x4e8   : > { %p2143_p2 = por %p2142_p13, %p2141_p10 }
 0x4ea   : > { %p2144_p3 = pnand %p2143_p2, %p2137_p1 }
 0x52c   : > { %v751_v22 = vpop.xlane.xlu1 %750 }
 0x52d   : > { %v769_v23 = vsub.f32 %v1754_v46, %v751_v22 }
 0x52f   : > { %v779_v30 = vmul.f32 1.442695, %v769_v23 }
 0x530   : > { %v745_v24 = vpop.xlane.xlu1 %744 }
 0x531   : > { %v767_v25 = vsub.f32 %v712_v57, %v745_v24 }
 0x532   : > { %v748_v26 = vpop.xlane.xlu0 %747 }
 0x533   : > { %v775_v27 = vmul.f32 1.442695, %v767_v25  ;;  %v768_v28 = vsub.f32 %v715_v52, %v748_v26 }
 0x534   : > { %v754_v32 = vpop.xlane.xlu1 %753 }
 0x535   : > { %v777_v33 = vmul.f32 1.442695, %v768_v28  ;;  %v770_v35 = vsub.f32 %v1755_v58, %v754_v32  ;;  %1956 = vpow2.f32 %v775_v27 }
 0x537   : > { %1958 = vpow2.f32 %v777_v33  ;;  %v781_v36 = vmul.f32 1.442695, %v770_v35 }
 0x538   : > { %1960 = vpow2.f32 %v779_v30  ;;  %v763_v29 = vpop.xlane.xlu1 %762 }
 0x539   : > { %1962 = vpow2.f32 %v781_v36  ;;  %v773_v45 = vsub.f32 %v2560_v61, %v763_v29 }
 0x53b   : > { %v787_v53 = vmul.f32 1.442695, %v773_v45 }
 0x53c   : > { %v757_v37 = vpop.xlane.xlu1 %756 }
 0x53d   : > { %v771_v31 = vsub.f32 %v728_v63, %v757_v37 }
 0x53f   : > { %v783_v48 = vmul.f32 1.442695, %v771_v31 }
 0x540   : > { %v766_v43 = vpop.xlane.xlu1 %765 }
 0x541   : > { %v774_v44 = vsub.f32 %v1759_v1, %v766_v43  ;;  %1964 = vpow2.f32 %v783_v48 }
 0x542   : > { %v2607_v47 = vpop.eup %1956 }
 0x543   : > { %v789_v38 = vmul.f32 1.442695, %v774_v44 }
 0x544   : > { %v2609_v49 = vpop.eup %1958  ;;  %v760_v39 = vpop.xlane.xlu1 %759 }
 0x545   : > { %v2611_v50 = vpop.eup %1960  ;;  %v772_v40 = vsub.f32 %v2566_v3, %v760_v39  ;;  %v815_v41 = vpack.c.bf16 %v2609_v49, %v2607_v47  ;;  %1966 = vpow2.f32 %v789_v38  ;;  %v794_v48 = vsel %vm348_vm0, %v2609_v49, 0.0 }
 0x546   : > { %v2616_v51 = vpop.eup %1962  ;;  %v791_v38 = vsel %vm348_vm0, %v2607_v47, 0.0 }
 0x547   : > { %v816_v54 = vpack.c.bf16 %v2616_v51, %v2611_v50  ;;  %v785_v42 = vmul.f32 1.442695, %v772_v40  ;;  %1768 = vmatprep.mubr.msk.bf16.mxu0 %vm348_vm0, %v815_v41  ;;  %v800_v39 = vsel %vm348_vm0, %v2616_v51, 0.0  ;;  %v797_v40 = vsel %vm348_vm0, %v2611_v50, 0.0 }
 0x549   : > { %1968 = vpow2.f32 %v785_v42  ;;  %1769 = vmatmul.mubr.msk.bf16.vlgmr.msra.gmra.mxu0 %vm348_vm0, %v816_v54 }
 0x54a   : > { %1970 = vpow2.f32 %v787_v53  ;;  %1793 = vmatpush3.bf16.msra.mxu0 %v2531_v34 }
 0x54b   : > { %1794 = vmatprep.subr.bf16.mxu0 %v1143_v21 }
 0x54c   : > { %v1066_v46 = vpop.xlane.xlu0 %1065 }
 0x54d   : > { %v1084_v52 = vsub.f32 %v2570_v5, %v1066_v46 }
 0x54e   : > { %1795 = vmatpush3.bf16.msra.mxu0 %v1143_v21  ;;  %v2626_v61 = vpop.eup %1964 }
 0x54f   : > { %v1094_v3 = vmul.f32 1.442695, %v1084_v52  ;;  %v803_v53 = vsel %vm348_vm0, %v2626_v61, 0.0 }
 0x550   : > { %v1060_v55 = vpop.xlane.xlu0 %1059  ;;  %v1069_v57 = vpop.xlane.xlu1 %1068 }
 0x551   : > { %v1082_v58 = vsub.f32 %v2574_v7, %v1060_v55  ;;  %v1085_v59 = vsub.f32 %v2576_v8, %v1069_v57 }
 0x552   : > { %v2628_v0 = vpop.eup %1966 }
 0x553   : > { %v1090_v60 = vmul.f32 1.442695, %v1082_v58  ;;  %v1096_v56 = vmul.f32 1.442695, %v1085_v59  ;;  %v812_v47 = vsel %vm348_vm0, %v2628_v0, 0.0 }
 0x554   : > { %v1078_v62 = vpop.xlane.xlu0 %1077  ;;  %v1063_v63 = vpop.xlane.xlu1 %1062 }
 0x555   : > { %1972 = vpow2.f32 %v1090_v60  ;;  %v1083_v34 = vsub.f32 %v2582_v11, %v1063_v63  ;;  %v1088_v11 = vsub.f32 %v2584_v12, %v1078_v62 }
 0x556   : > { %v2631_v1 = vpop.eup %1968  ;;  %1974 = vpow2.f32 %v1096_v56 }
 0x557   : > { %v2633_v2 = vpop.eup %1970  ;;  %v1092_v4 = vmul.f32 1.442695, %v1083_v34  ;;  %v817_v5 = vpack.c.bf16 %v2631_v1, %v2626_v61  ;;  %v1102_v20 = vmul.f32 1.442695, %v1088_v11  ;;  %v806_v41 = vsel %vm348_vm0, %v2631_v1, 0.0 }
 0x558   : > { %v1072_v6 = vpop.xlane.xlu0 %1071  ;;  %v1081_v7 = vpop.xlane.xlu1 %1080  ;;  %v818_v8 = vpack.c.bf16 %v2628_v0, %v2633_v2  ;;  %v809_v49 = vsel %vm348_vm0, %v2633_v2, 0.0 }
 0x559   : > { %v1086_v9 = vsub.f32 %v2590_v15, %v1072_v6  ;;  %v1089_v10 = vsub.f32 %v2592_v16, %v1081_v7  ;;  %1772 = vmatprep.mubr.msk.bf16.mxu0 %vm348_vm0, %v817_v5  ;;  %1976 = vpow2.f32 %v1092_v4 }
 0x55a   : > { %1773 = vmatmul.mubr.msk.bf16.gmra.mxu0 %vm348_vm0, %v818_v8  ;;  %1978 = vpow2.f32 %v1094_v3 }
 0x55b   : > { %v1098_v13 = vmul.f32 1.442695, %v1086_v9  ;;  %v1104_v14 = vmul.f32 1.442695, %v1089_v10 }
 0x55c   : > { %v1075_v17 = vpop.xlane.xlu1 %1074  ;;  %v1139_v22 = vpop.permute.xlu0 %1138 }
 0x55d   : > { %v1087_v18 = vsub.f32 %v2598_v19, %v1075_v17  ;;  %1980 = vpow2.f32 %v1098_v13 }
 0x55e   : > { %1982 = vpow2.f32 %v1104_v14 }
 0x55f   : > { %v1100_v21 = vmul.f32 1.442695, %v1087_v18 }
 0x560   : > { %v1141_v15 = vpop.permute.xlu1 %1140 }
 0x561   : > { %1984 = vpow2.f32 %v1100_v21  ;;  %1796 = vmatprep.subr.bf16.mxu0 %v1141_v15 }
 0x562   : > { %v1973_v16 = vpop.eup %1972  ;;  %1797 = vmatpush3.bf16.msra.mxu0 %v1141_v15  ;;  %1986 = vpow2.f32 %v1102_v20 }
 0x563   : > { %1798 = vmatprep.subr.bf16.mxu0 %v1139_v22  ;;  %v1106_v23 = vsel %vm348_vm0, %v1973_v16, 0.0  ;;  %v1975_v12 = vpop.eup %1974 }
 0x564   : > { %1107 = vadd.xlane.f32.xlu1 %v1106_v23  ;;  %v1115_v19 = vsel %vm348_vm0, %v1975_v12, 0.0 }
 0x566   : > { %1799 = vmatpush3.bf16.msra.mxu0 %v1139_v22  ;;  %v1977_v24 = vpop.eup %1976 }
 0x567   : > { %v1979_v25 = vpop.eup %1978  ;;  %v1109_v26 = vsel %vm348_vm0, %v1977_v24, 0.0  ;;  %v1130_v27 = vpack.c.bf16 %v1977_v24, %v1973_v16 }
 0x568   : > { %1116 = vadd.xlane.f32.xlu1 %v1115_v19  ;;  %v1131_v28 = vpack.c.bf16 %v1975_v12, %v1979_v25  ;;  %1110 = vadd.xlane.f32.xlu0 %v1109_v26  ;;  %v1112_v32 = vsel %vm348_vm0, %v1979_v25, 0.0 }
 0x569   : > { %1800 = vmatprep.mubr.msk.bf16.mxu0 %vm348_vm0, %v1130_v27 }
 0x56a   : > { %1801 = vmatmul.mubr.msk.bf16.vlgmr.msra.gmra.mxu0 %vm348_vm0, %v1131_v28  ;;  %v1981_v30 = vpop.eup %1980 }
 0x56b   : > { %v1983_v33 = vpop.eup %1982  ;;  %v1118_v31 = vsel %vm348_vm0, %v1981_v30, 0.0 }
 0x56c   : > { %1113 = vadd.xlane.f32.xlu0 %v1112_v32  ;;  %v1127_v44 = vsel %vm348_vm0, %v1983_v33, 0.0 }
 0x56e   : > { %v1985_v35 = vpop.eup %1984 }
 0x56f   : > { %v1121_v36 = vsel %vm348_vm0, %v1985_v35, 0.0  ;;  %v1132_v29 = vpack.c.bf16 %v1985_v35, %v1981_v30  ;;  %v1987_v37 = vpop.eup %1986  ;;  %v1946_v35 = vld [vmem:[#allocation9 + $0x18] sm:$0xff]  }
 0x570   : > { %1122 = vadd.xlane.f32.xlu1 %v1121_v36  ;;  %1119 = vadd.xlane.f32.xlu0 %v1118_v31  ;;  %v1133_v43 = vpack.c.bf16 %v1983_v33, %v1987_v37  ;;  %v1124_v45 = vsel %vm348_vm0, %v1987_v37, 0.0  ;;  %v1947_v36 = vld [vmem:[#allocation9 + $0x10] sm:$0xff]  }
 0x571   : > { %1804 = vmatprep.mubr.msk.bf16.mxu0 %vm348_vm0, %v1132_v29  ;;  %1808 = vmatprep.subr.bf16.mxu0 %v1946_v35 }
 0x572   : > { %1805 = vmatmul.mubr.msk.bf16.gmra.mxu0 %vm348_vm0, %v1133_v43  ;;  %1824 = vmatprep.subr.bf16.mxu1 %v1946_v35  ;;  %v1948_v43 = vld [vmem:[#allocation9 + $0x8] sm:$0xff]  }
 0x573   : > { %1809 = vmatpush3.bf16.msra.mxu0 %v1946_v35  ;;  %1828 = vmatpush3.bf16.msra.mxu1 %v1946_v35 }
 0x574   : > { %1128 = vadd.xlane.f32.xlu1 %v1127_v44  ;;  %1125 = vadd.xlane.f32.xlu0 %v1124_v45 }
 0x575   : > { %1810 = vmatprep.subr.bf16.mxu0 %v1947_v36  ;;  %1825 = vmatprep.subr.bf16.mxu1 %v1947_v36 }
 0x577   : > { %1811 = vmatpush3.bf16.msra.mxu0 %v1947_v36  ;;  %1829 = vmatpush3.bf16.msra.mxu1 %v1947_v36 }
 0x578   : > { %795 = vadd.xlane.f32.xlu1 %v794_v48  ;;  %792 = vadd.xlane.f32.xlu0 %v791_v38 }
 0x579   : > { %1812 = vmatprep.subr.bf16.mxu0 %v1948_v43  ;;  %1826 = vmatprep.subr.bf16.mxu1 %v1948_v43 }
 0x57b   : > { %1813 = vmatpush3.bf16.msra.mxu0 %v1948_v43  ;;  %1830 = vmatpush3.bf16.msra.mxu1 %v1948_v43  ;;  %v2021_v43 = vld [vmem:[%s2417_s19 + $0x8] sm:$0xff] }
 0x57c   : > { %801 = vadd.xlane.f32.xlu1 %v800_v39  ;;  %798 = vadd.xlane.f32.xlu0 %v797_v40 }
 0x580   : > { %807 = vadd.xlane.f32.xlu1 %v806_v41  ;;  %804 = vadd.xlane.f32.xlu0 %v803_v53  ;;  %v1949_v53 = vld [vmem:[#allocation9] sm:$0xff]  }
 0x581   : > { %1814 = vmatprep.subr.bf16.mxu0 %v1949_v53  ;;  %1827 = vmatprep.subr.bf16.mxu1 %v1949_v53 }
 0x582   : > { %1815 = vmatpush3.bf16.msra.mxu0 %v1949_v53  ;;  %1831 = vmatpush3.bf16.msra.mxu1 %v1949_v53 }
 0x584   : > { %813 = vadd.xlane.f32.xlu1 %v812_v47  ;;  %810 = vadd.xlane.f32.xlu0 %v809_v49 }
 0x5ed   : > { %v1108_v51 = vpop.xlane.xlu1 %1107 }
 0x5f1   : > { %v2673_v50 = vpop.xlane.xlu0 %1110  ;;  %v1117_v54 = vpop.xlane.xlu1 %1116 }
 0x5f5   : > { %v2675_v42 = vpop.xlane.xlu0 %1113 }
 0x5f9   : > { %v2677_v46 = vpop.xlane.xlu1 %1122  ;;  %v2679_v55 = vpop.xlane.xlu0 %1119 }
 0x5fd   : > { %v2681_v57 = vpop.xlane.xlu1 %1128  ;;  %v2683_v58 = vpop.xlane.xlu0 %1125 }
 0x601   : > { %v796_v59 = vpop.xlane.xlu1 %795  ;;  %v793_v52 = vpop.xlane.xlu0 %792 }
 0x602   : > { %1988 = vrcp.f32 %v796_v59 }
 0x603   : > { %1990 = vrcp.f32 %v793_v52 }
 0x605   : > { %v802_v60 = vpop.xlane.xlu1 %801  ;;  %v799_v56 = vpop.xlane.xlu0 %798 }
 0x606   : > { %1992 = vrcp.f32 %v802_v60 }
 0x607   : > { %1994 = vrcp.f32 %v799_v56 }
 0x609   : > { %v1770_v61 = vpop.f32.mrf.mxu0  ;;  %v808_v62 = vpop.xlane.xlu1 %807 }
 0x60a   : > { %v805_v63 = vpop.xlane.xlu0 %804 }
 0x60b   : > { %v865_v0 = vpop.f32.mrf.mxu0  ;;  %1996 = vrcp.f32 %v805_v63 }
 0x60d   : > { %v1771_v34 = vpop.f32.mrf.mxu0  ;;  %v814_v2 = vpop.xlane.xlu1 %813 }
 0x60e   : > { %v811_v1 = vpop.xlane.xlu0 %810 }
 0x60f   : > { %v1989_v3 = vpop.eup %1988  ;;  %1998 = vrcp.f32 %v811_v1  ;;  %v868_v4 = vpop.f32.mrf.mxu0 }
 0x610   : > { %v1991_v5 = vpop.eup %1990  ;;  %v905_v6 = vmul.f32 %v1989_v3, %v868_v4  ;;  %2000 = vrcp.f32 %v814_v2 }
 0x611   : > { %v904_v7 = vmul.f32 %v1991_v5, %v865_v0  ;;  %2002 = vrcp.f32 %v808_v62 }
 0x612   : > { %v1688_v8 = vpack.c.bf16 %v905_v6, %v905_v6  ;;  %2004 = vrcp.f32 %v1108_v51 }
 0x613   : > { %v1993_v9 = vpop.eup %1992  ;;  %v1687_v10 = vpack.c.bf16 %v904_v7, %v904_v7  ;;  %2006 = vrcp.f32 %v1117_v54 }
 0x614   : > { %v1995_v11 = vpop.eup %1994  ;;  %v907_v13 = vmul.f32 %v1993_v9, %v1771_v34  ;;  %946 = vst.msk [vmem:[#allocation2 + $0x4] sm:$0xf] %vm944_vm2, %v1688_v8  ;;  %2008 = vrcp.f32 %v2673_v50 }
 0x615   : > { %v906_v14 = vmul.f32 %v1995_v11, %v1770_v61  ;;  %945 = vst.msk [vmem:[#allocation2] sm:$0xf] %vm944_vm2, %v1687_v10  ;;  %2010 = vrcp.f32 %v2675_v42 }
 0x616   : > { %v1690_v17 = vpack.c.bf16 %v907_v13, %v907_v13  ;;  %2012 = vrcp.f32 %v2679_v55 }
 0x617   : > { %v1689_v18 = vpack.c.bf16 %v906_v14, %v906_v14  ;;  %2014 = vrcp.f32 %v2677_v46 }
 0x618   : > { %948 = vst.msk [vmem:[#allocation2 + $0xc] sm:$0xf] %vm944_vm2, %v1690_v17  ;;  %v1997_v21 = vpop.eup %1996  ;;  %2016 = vrcp.f32 %v2681_v57 }
 0x619   : > { %947 = vst.msk [vmem:[#allocation2 + $0x8] sm:$0xf] %vm944_vm2, %v1689_v18  ;;  %2018 = vrcp.f32 %v2683_v58 }
 0x61a   : > { %v1774_v20 = vpop.f32.mrf.mxu0 }
 0x61c   : > { %v1999_v15 = vpop.eup %1998  ;;  %v881_v16 = vpop.f32.mrf.mxu0 }
 0x61d   : > { %v910_v22 = vmul.f32 %v1999_v15, %v1774_v20  ;;  %v908_v23 = vmul.f32 %v1997_v21, %v881_v16  ;;  %v2001_v12 = vpop.eup %2000  ;;  %v1668_v21 = vld [vmem:[%s2806_s6] ss:$0 sm:$0xff] }
 0x61e   : > { %v1775_v24 = vpop.f32.mrf.mxu0  ;;  %v2003_v27 = vpop.eup %2002 }
 0x61f   : > { %v1693_v19 = vpack.c.bf16 %v910_v22, %v910_v22  ;;  %v1691_v25 = vpack.c.bf16 %v908_v23, %v908_v23  ;;  %v911_v26 = vmul.f32 %v2001_v12, %v1775_v24  ;;  %v2005_v37 = vpop.eup %2004 }
 0x620   : > { %v884_v28 = vpop.f32.mrf.mxu0  ;;  %v2007_v45 = vpop.eup %2006 }
 0x621   : > { %951 = vst.msk [vmem:[#allocation2 + $0x18] sm:$0xf] %vm944_vm2, %v1693_v19  ;;  %949 = vst.msk [vmem:[#allocation2 + $0x10] sm:$0xf] %vm944_vm2, %v1691_v25  ;;  %v1694_v30 = vpack.c.bf16 %v911_v26, %v911_v26  ;;  %v909_v32 = vmul.f32 %v2003_v27, %v884_v28  ;;  %v2009_v40 = vpop.eup %2008 }
 0x622   : > { %v2011_v49 = vpop.eup %2010 }
 0x623   : > { %952 = vst.msk [vmem:[#allocation2 + $0x1c] sm:$0xf] %vm944_vm2, %v1694_v30  ;;  %v1692_v33 = vpack.c.bf16 %v909_v32, %v909_v32  ;;  %v2013_v55 = vpop.eup %2012 }
 0x624   : > { %v2015_v52 = vpop.eup %2014 }
 0x625   : > { %950 = vst.msk [vmem:[#allocation2 + $0x14] sm:$0xf] %vm944_vm2, %v1692_v33  ;;  %v2017_v56 = vpop.eup %2016 }
 0x626   : > { %v2019_v62 = vpop.eup %2018 }
 0x62a   : > { %v1802_v29 = vpop.f32.mrf.mxu0 }
 0x62b   : > { %v1237_v50 = vmul.f32 %v2011_v49, %v1802_v29  ;;  %v2020_v29 = vld [vmem:[%s2417_s19] sm:$0xff] }
 0x62c   : > { %v1196_v31 = vpop.f32.mrf.mxu0 }
 0x62d   : > { %v1235_v44 = vmul.f32 %v2005_v37, %v1196_v31  ;;  %v1697_v58 = vpack.c.bf16 %v1237_v50, %v1237_v50  ;;  %v2025_v50 = vld [vmem:[%s2417_s19 + $0x28] sm:$0xff] }
 0x62e   : > { %v1803_v48 = vpop.f32.mrf.mxu0 }
 0x62f   : > { %v1695_v38 = vpack.c.bf16 %v1235_v44, %v1235_v44  ;;  %v1238_v39 = vmul.f32 %v2007_v45, %v1803_v48  ;;  %v2022_v48 = vld [vmem:[%s2417_s19 + $0x10] sm:$0xff] }
 0x630   : > { %v1199_v41 = vpop.f32.mrf.mxu0 }
 0x631   : > { %v1236_v47 = vmul.f32 %v2009_v40, %v1199_v41  ;;  %1267 = vrot.lane.b32.xlu0 %v1695_v38, %s2219_s30  ;;  %v1698_v54 = vpack.c.bf16 %v1238_v39, %v1238_v39  ;;  %v2023_v40 = vld [vmem:[%s2417_s19 + $0x18] sm:$0xff] }
 0x632   : > { %v1806_v51 = vpop.f32.mrf.mxu0 }
 0x633   : > { %v1696_v42 = vpack.c.bf16 %v1236_v47, %v1236_v47  ;;  %v1241_v63 = vmul.f32 %v2019_v62, %v1806_v51  ;;  %v2024_v47 = vld [vmem:[%s2417_s19 + $0x20] sm:$0xff] }
 0x634   : > { %v1212_v46 = vpop.f32.mrf.mxu0 }
 0x635   : > { %1269 = vrot.lane.b32.xlu1 %v1696_v42, %s2219_s30  ;;  %1273 = vrot.lane.b32.xlu0 %v1698_v54, %s2219_s30  ;;  %v1239_v59 = vmul.f32 %v2013_v55, %v1212_v46  ;;  %v1701_v2 = vpack.c.bf16 %v1241_v63, %v1241_v63  ;;  %v2026_v46 = vld [vmem:[%s2417_s19 + $0x30] sm:$0xff] }
 0x636   : > { %v1807_v57 = vpop.f32.mrf.mxu0 }
 0x637   : > { %v1699_v0 = vpack.c.bf16 %v1239_v59, %v1239_v59  ;;  %v1242_v34 = vmul.f32 %v2017_v56, %v1807_v57 }
 0x638   : > { %v1215_v60 = vpop.f32.mrf.mxu0 }
 0x639   : > { %v1240_v61 = vmul.f32 %v2015_v52, %v1215_v60  ;;  %1271 = vrot.lane.b32.xlu1 %v1697_v58, %s2219_s30  ;;  %v1702_v3 = vpack.c.bf16 %v1242_v34, %v1242_v34  ;;  %v2027_v58 = vld [vmem:[%s2417_s19 + $0x38] sm:$0xff] }
 0x63b   : > { %v1700_v1 = vpack.c.bf16 %v1240_v61, %v1240_v61 }
 0x63d   : > { %1275 = vrot.lane.b32.xlu1 %v1699_v0, %s2219_s30  ;;  %1277 = vrot.lane.b32.xlu0 %v1700_v1, %s2219_s30 }
 0x641   : > { %1279 = vrot.lane.b32.xlu1 %v1701_v2, %s2219_s30  ;;  %1281 = vrot.lane.b32.xlu0 %v1702_v3, %s2219_s30 }
 0x6a3   : > { %v1268_v4 = vpop.permute.xlu0 %1267 }
 0x6a4   : > { %1292 = vst.msk [vmem:[#allocation2] sm:$0xf] %vm1291_vm3, %v1268_v4 }
 0x6a7   : > { %v1274_v5 = vpop.permute.xlu0 %1273  ;;  %v1270_v6 = vpop.permute.xlu1 %1269 }
 0x6a8   : > { %1295 = vst.msk [vmem:[#allocation2 + $0xc] sm:$0xf] %vm1291_vm3, %v1274_v5  ;;  %1293 = vst.msk [vmem:[#allocation2 + $0x4] sm:$0xf] %vm1291_vm3, %v1270_v6 }
 0x6ab   : > { %v1272_v7 = vpop.permute.xlu1 %1271 }
 0x6ac   : > { %1294 = vst.msk [vmem:[#allocation2 + $0x8] sm:$0xf] %vm1291_vm3, %v1272_v7 }
 0x6af   : > { %v1278_v8 = vpop.permute.xlu0 %1277  ;;  %v1276_v9 = vpop.permute.xlu1 %1275  ;;  %v1950_v10 = vld [vmem:[#allocation2] sm:$0xff]  }
 0x6b0   : > { %1297 = vst.msk [vmem:[#allocation2 + $0x14] sm:$0xf] %vm1291_vm3, %v1278_v8  ;;  %1296 = vst.msk [vmem:[#allocation2 + $0x10] sm:$0xf] %vm1291_vm3, %v1276_v9  ;;  %1816 = vmatprep.mubr.msk.bf16.mxu0 %vm348_vm0, %v1950_v10 }
 0x6b3   : > { %v1282_v11 = vpop.permute.xlu0 %1281  ;;  %v1280_v13 = vpop.permute.xlu1 %1279  ;;  %v1951_v14 = vld [vmem:[#allocation2 + $0x8] sm:$0xff]  }
 0x6b4   : > { %1299 = vst.msk [vmem:[#allocation2 + $0x1c] sm:$0xf] %vm1291_vm3, %v1282_v11  ;;  %1298 = vst.msk [vmem:[#allocation2 + $0x18] sm:$0xf] %vm1291_vm3, %v1280_v13  ;;  %1817 = vmatmul.mubr.msk.bf16.vlgmr.msra.gmra.mxu0 %vm348_vm0, %v1951_v14 }
 0x6b7   : > { %v1952_v17 = vld [vmem:[#allocation2 + $0x10] sm:$0xff]  }
 0x6b8   : > { %1820 = vmatprep.mubr.msk.bf16.mxu1 %vm348_vm0, %v1952_v17 }
 0x6bb   : > { %v1953_v18 = vld [vmem:[#allocation2 + $0x18] sm:$0xff]  }
 0x6bc   : > { %1821 = vmatmul.mubr.msk.bf16.vlgmr.msra.gmra.mxu1 %vm348_vm0, %v1953_v18 }
 0x774   : > { %v1818_v20 = vpop.f32.mrf.mxu0 }
 0x775   : > { %v1422_v19 = vadd.f32 %v1818_v20, %v1668_v21 }
 0x776   : > { %v1413_v15 = vpop.f32.mrf.mxu0 }
 0x777   : > { %v1414_v16 = vadd.f32 %v1668_v21, %v1413_v15 }
 0x778   : > { %v1819_v22 = vpop.f32.mrf.mxu0 }
 0x779   : > { %1444 = vxpose.xlu1.b32.start [1/8] (short) (narrow) %v1414_v16, 64  ;;  %v1425_v26 = vadd.f32 %v1819_v22, %v1668_v21 }
 0x77a   : > { %v1416_v23 = vpop.f32.mrf.mxu0 }
 0x77b   : > { %v1417_v12 = vadd.f32 %v1668_v21, %v1416_v23 }
 0x77c   : > { %v1822_v24 = vpop.f32.mrf.mxu1 }
 0x77d   : > { %1445 = vxpose.xlu1.b32.cont [2/8] (short) (narrow) %v1417_v12, 64  ;;  %v1438_v33 = vadd.f32 %v1822_v24, %v1668_v21 }
 0x77e   : > { %v1429_v25 = vpop.f32.mrf.mxu1 }
 0x77f   : > { %v1430_v28 = vadd.f32 %v1668_v21, %v1429_v25 }
 0x780   : > { %v1823_v27 = vpop.f32.mrf.mxu1 }
 0x781   : > { %1446 = vxpose.xlu1.b32.cont [3/8] (short) (narrow) %v1422_v19, 64  ;;  %v1441_v35 = vadd.f32 %v1823_v27, %v1668_v21 }
 0x782   : > { %v1432_v30 = vpop.f32.mrf.mxu1 }
 0x783   : > { %v1433_v32 = vadd.f32 %v1668_v21, %v1432_v30 }
 0x785   : > { %1447 = vxpose.xlu1.b32.cont [4/8] (short) (narrow) %v1425_v26, 64 }
 0x789   : > { %1448 = vxpose.xlu1.b32.cont [5/8] (short) (narrow) %v1430_v28, 64 }
 0x78d   : > { %1449 = vxpose.xlu1.b32.cont [6/8] (short) (narrow) %v1433_v32, 64 }
 0x791   : > { %1450 = vxpose.xlu1.b32.cont [7/8] (short) (narrow) %v1438_v33, 64 }
 0x795   : > { %1451 = vxpose.xlu1.b32.end [8/8] (short) (narrow) %v1441_v35, 64 }
 0x7f5   : > { %v1460_v36 = vpop.trf.xlu1 }
 0x7f6   : > { %v1476_v37 = vadd.f32 %v2020_v29, %v1460_v36 }
 0x7f8   : > { %1484 = vst.msk [vmem:[%s2725_s17] sm:$0xff] %vm348_vm0, %v1476_v37 }
 0x7f9   : > { %v1461_v31 = vpop.trf.xlu1 }
 0x7fa   : > { %v1477_v44 = vadd.f32 %v2021_v43, %v1461_v31 }
 0x7fc   : > { %1485 = vst.msk [vmem:[%s2725_s17 + $0x8] sm:$0xff] %vm348_vm0, %v1477_v44 }
 0x7fd   : > { %v1462_v45 = vpop.trf.xlu1 }
 0x7fe   : > { %v1478_v38 = vadd.f32 %v2022_v48, %v1462_v45 }
 0x800   : > { %1486 = vst.msk [vmem:[%s2725_s17 + $0x10] sm:$0xff] %vm348_vm0, %v1478_v38 }
 0x801   : > { %v1463_v39 = vpop.trf.xlu1 }
 0x802   : > { %v1479_v41 = vadd.f32 %v2023_v40, %v1463_v39 }
 0x804   : > { %1487 = vst.msk [vmem:[%s2725_s17 + $0x18] sm:$0xff] %vm348_vm0, %v1479_v41 }
 0x805   : > { %v1464_v53 = vpop.trf.xlu1 }
 0x806   : > { %v1480_v49 = vadd.f32 %v2024_v47, %v1464_v53 }
 0x808   : > { %1488 = vst.msk [vmem:[%s2725_s17 + $0x20] sm:$0xff] %vm348_vm0, %v1480_v49 }
 0x809   : > { %v1465_v51 = vpop.trf.xlu1 }
 0x80a   : > { %v1481_v54 = vadd.f32 %v2025_v50, %v1465_v51 }
 0x80c   : > { %1489 = vst.msk [vmem:[%s2725_s17 + $0x28] sm:$0xff] %vm348_vm0, %v1481_v54 }
 0x80d   : > { %v1466_v42 = vpop.trf.xlu1 }
 0x80e   : > { %v1482_v55 = vadd.f32 %v2026_v46, %v1466_v42 }
 0x810   : > { %1490 = vst.msk [vmem:[%s2725_s17 + $0x30] sm:$0xff] %vm348_vm0, %v1482_v55 }
 0x811   : > { %v1467_v57 = vpop.trf.xlu1 }
 0x812   : > { %v1483_v59 = vadd.f32 %v2027_v58, %v1467_v57 }
 0x814   : > { %1491 = vst.msk [vmem:[%s2725_s17 + $0x38] sm:$0xff] %vm348_vm0, %v1483_v59 }
 0x815   : > { %2147 = shalt.err (!%p2144_p3)
}
 0x816   : > { %s2148_s19 = scalar_lea.hbm %s2752_s14, 1024  ;;  %s2152_s13 = scalar_lea.hbm %s2807_s7, 2048 }
 0x817   : > { %p2149_p6 = scmp.ne.s32.totalorder %s2752_s14, %s2148_s19  ;;  %p2153_p0 = scmp.lt.s32.totalorder %s2752_s14, %s2807_s7 }
 0x818   : > { %p2154_p11 = scmp.lt.s32.totalorder %s2152_s13, %s2148_s19 }
 0x819   : > { %p2150_p4 = pnand %p2149_p6, %p2830_p12 }
 0x81a   : > { %p2155_p5 = por %p2154_p11, %p2153_p0 }
 0x81b   : > { %p2151_p8 = pneg %p2150_p4 }
 0x81d   : > { %p2156_p9 = pnand %p2155_p5, %p2151_p8 }
 0x81f   : > { %2159 = shalt.err (!%p2156_p9)
}
 0x820   : > { %s2221_s12 = smov 128   ;;  %s2222_s15 = smov 8  }
 0x821   : > { %1860 = dma.vmem_to_hbm [thread:$0]  (%p2830_p12), %s2754_s20, 1024, %s2752_s14, %s1493_s10, %s2221_s12, %s2221_s12, %s2222_s15  }
 0x822 PF: > { %s1521_s28 = sand.u32 1, %s2194_s24   ;;  %p2831_p7 = scmp.ne.s32.totalorder %s2816_s8, 0 }
 0x823   : > { %p2832_p1 = scmp.ge.s32.totalorder %s2206_s27, 2  ;;  %s1522_s22 = scalar_lea.sflag [#allocation5], %s1521_s28 }
 0x825   : > { %p1877_p10 = pnand %p2832_p1, %p2831_p7 }
 0x827   : > { %p1878_p13 = pneg %p1877_p10 }
 0x829   : > { %2189 = dma.done.wait (%p1878_p13), %s1522_s22, 1024  }
 0x82a   : > { %2191 = vsyncadd (%p1878_p13), %s1522_s22, 4294966272  ;;  %p22_p2 = scmp.ge.s32.totalorder %s2353_s18, 4   ;;  %s2833_s24 = smov %s2198_s25 }
 0x82b   : > { %s2834_s25 = smov %s2202_s26  ;;  %s2835_s26 = smov %s2363_s21 }
 0x82c   : > { %s2836_s27 = smov %s2353_s18  ;;  %24 = sbr.rel (!%p22_p2) target bundleno = 9 (0x9), region = 105 }
 0x831   :  { %1527 = vsyncpa [#allocation4], 1 }
 0x832   :  { %1529 = vsyncpa [#allocation4 + $0x1], 1 }
 0x833   :  { %1530 = vsyncpa [#allocation7], 1 }
 0x834   :  { %1531 = vsyncpa [#allocation10], 1 }
 0x835   :  { %1532 = vsyncpa [#allocation5], 1 }
 0x836   :  { %1534 = vsyncpa [#allocation5 + $0x1], 1 }

</bundles_post_ra>
